<compile_context>
chip_gen: v6e
topology: v6e:2x2x1
jax: 0.10.0
libtpu: 0.0.40
codegen_flags: <defaults>
</compile_context>

<pallas_src>
import jax
import jax.numpy as jnp
from jax import lax
from jax.experimental import pallas as pl
from jax.experimental.pallas import tpu as pltpu

D_DIM = 16          # d_dim (must be divisible by 4)
N_CLASSES = 10
EMB_DIM = 10
BN_EPS = 1e-5


# ---------------- fused Pallas kernel (per-sample grid step) ----------------

def _make_fused_kernel(H2, W2):
    """Kernel for one sample: conv1+LReLU -> conv2+BN+LReLU -> Linear+Sigmoid."""
    HW = H2 * W2                                     # conv2 output positions

    def kernel(p1_ref, w1m_ref, w2m_ref, scale_ref, shift_ref, wfm_ref, bf_ref,
               out_ref):
        c1 = w1m_ref.shape[1]                        # 128 conv1 out channels
        c2 = w2m_ref.shape[1]                        # 256 conv2 out channels

        # ---- Conv1 (im2col matmul over the 4 output phases of this sample)
        #      + LeakyReLU(0.2).  Rows are phase-major: (sh, sw, i, j) with
        #      conv1 output position (h1, w1) = (2i+sh, 2j+sw).
        y1 = jnp.dot(p1_ref[...], w1m_ref[...],
                     preferred_element_type=jnp.float32)          # (4*HW, c1)
        y1 = jnp.where(y1 > 0, y1, 0.2 * y1)

        # ---- Conv2 (3x3, stride 2, pad 1) as 9 shift-and-accumulate taps.
        # Tap (kh, kw) needs y1[2*h2+kh-1, 2*w2+kw-1]; in the phase-major
        # layout that is a fixed row offset inside one phase block, so each tap
        # is a static slice of y1 + an out-of-bounds mask, then a K=128 matmul.
        row = lax.broadcasted_iota(jnp.int32, (HW, c1), 0)        # h2*W2 + w2
        acc = jnp.zeros((HW, c2), jnp.float32)
        for kh in range(3):
            for kw in range(3):
                p = ((kh + 1) % 2) * 2 + (kw + 1) % 2             # source phase
                s = (W2 if kh == 0 else 0) + (1 if kw == 0 else 0)  # row shift
                start = p * HW - s
                blk = y1[start:start + HW, :]                     # (HW, c1)
                cond = None
                if kh == 0:                                       # needs h2 >= 1
                    cond = row >= W2
                if kw == 0:                                       # needs w2 >= 1
                    cmask = (row % W2) >= 1
                    cond = cmask if cond is None else jnp.logical_and(cond, cmask)
                if cond is not None:
                    blk = jnp.where(cond, blk, 0.0)
                t = kh * 3 + kw
                acc = acc + jnp.dot(blk, w2m_ref[t * c1:(t + 1) * c1, :],
                                    preferred_element_type=jnp.float32)

        # ---- BatchNorm2d (eval mode, affine folded at load time) + LeakyReLU.
        y2 = acc * scale_ref[...] + shift_ref[...]
        y2 = jnp.where(y2 > 0, y2, 0.2 * y2)                      # (HW, c2)

        # ---- Flatten + Linear(256*H2*W2 -> 1) + Sigmoid.
        # wfm is the final weight pre-permuted to (h2*W2+w2, c) so the flatten
        # is a no-op; the K=4096, N=1 product is a VPU multiply + reduction
        # (lane-dense, no (4096, 1) operand, no masked N=1 store until the end).
        prod = y2 * wfm_ref[...]
        logit = jnp.sum(jnp.sum(prod, axis=1, keepdims=True),
                        axis=0, keepdims=True)                    # (1, 1)
        out_ref[0] = jax.nn.sigmoid(logit + bf_ref[...])

    return kernel


# ---------------- JAX-side glue -----------------------------------------------

def _conv1_patches(h_nhwc, H2, W2):
    """NHWC conv1 input -> per-sample phase-major patch matrix.

    Rows ordered (b, sh, sw, i, j) with conv1 output (h1, w1) = (2i+sh, 2j+sw);
    columns ordered (kh, kw, cin) to match the (kh, kw, cin, cout) weight matrix.
    """
    B, H, W, C = h_nhwc.shape
    Ho, Wo = H // 2, W // 2
    xp = jnp.pad(h_nhwc, ((0, 0), (1, 1), (1, 1), (0, 0)))
    taps = [xp[:, kh:kh + 2 * Ho:2, kw:kw + 2 * Wo:2, :]
            for kh in range(3) for kw in range(3)]
    pt = jnp.stack(taps, axis=3)                        # (B, Ho, Wo, 9, C)
    pt = pt.reshape(B, H2, 2, W2, 2, 9, C)              # (B, i, sh, j, sw, 9, C)
    pt = pt.transpose(0, 2, 4, 1, 3, 5, 6)              # (B, sh, sw, i, j, 9, C)
    return pt.reshape(B * 4 * H2 * W2, 9 * C)


def prepare_params(params):
    """One-time ('load time') conversion of PyTorch-layout params to kernel layout."""
    H2 = W2 = D_DIM // 4
    scale = params["gamma"] / jnp.sqrt(params["rv"] + BN_EPS)
    shift = params["beta"] - params["rm"] * scale
    return dict(
        emb=params["emb"], w1=params["w1"], b1=params["b1"],
        # (Cout, Cin, kh, kw) -> (kh*kw*Cin, Cout)
        w1m=jnp.transpose(params["cw1"], (2, 3, 1, 0)).reshape(-1, 128),
        w2m=jnp.transpose(params["cw2"], (2, 3, 1, 0)).reshape(-1, 256),
        bn_scale=scale[None, :], bn_shift=shift[None, :],
        # final linear weight: CHW-flat (4096, 1) -> HWC tile (H2*W2, 256)
        wfm=params["wf"][:, 0].reshape(256, H2, W2).transpose(1, 2, 0)
                              .reshape(H2 * W2, 256),
        bf=params["bf"],
    )


def cgan_discriminator_forward(x, labels, kp):
    """x: (B, 3, D, D) float32 NCHW, labels: (B,) int32, kp: prepare_params(...)."""
    B = x.shape[0]
    H2 = W2 = D_DIM // 4
    HW = H2 * W2

    # Tiny glue kept in plain JAX (XLA fuses it into the input prep).
    emb = jnp.take(kp["emb"], labels, axis=0)                 # nn.Embedding gather
    lab = emb @ kp["w1"] + kp["b1"]                           # Linear(10 -> D*D)
    lab_img = lab.reshape(B, D_DIM, D_DIM, 1)                 # NHWC label plane
    x_nhwc = jnp.transpose(x, (0, 2, 3, 1))                   # public API stays NCHW
    h = jnp.concatenate([x_nhwc, lab_img], axis=-1)           # (B, D, D, 4)
    p1 = _conv1_patches(h, H2, W2)                            # (B*4*HW, 36)

    # TODO(synk): Dropout(0.4) and training-mode BatchNorm statistics are not
    # modeled; inference-mode semantics are used.
    out = pl.pallas_call(
        _make_fused_kernel(H2, W2),
        out_shape=jax.ShapeDtypeStruct((B, 1, 1), jnp.float32),
        grid=(B,),
        in_specs=[
            pl.BlockSpec((4 * HW, p1.shape[1]), lambda b: (b, 0)),     # per-sample
            pl.BlockSpec(kp["w1m"].shape, lambda b: (0, 0)),           # resident
            pl.BlockSpec(kp["w2m"].shape, lambda b: (0, 0)),
            pl.BlockSpec(kp["bn_scale"].shape, lambda b: (0, 0)),
            pl.BlockSpec(kp["bn_shift"].shape, lambda b: (0, 0)),
            pl.BlockSpec(kp["wfm"].shape, lambda b: (0, 0)),
            pl.BlockSpec(kp["bf"].shape, lambda b: (0, 0)),
        ],
        out_specs=pl.BlockSpec((1, 1, 1), lambda b: (b, 0, 0)),
        compiler_params=pltpu.CompilerParams(
            dimension_semantics=("parallel",)),   # batch across v7x's 2 TCs
    )(p1, kp["w1m"], kp["w2m"], kp["bn_scale"], kp["bn_shift"],
      kp["wfm"], kp["bf"])
    return out.reshape(B, 1)


# ---------------- deterministic parameter init (PyTorch layout) --------------

def init_params(key):
    ks = jax.random.split(key, 9)

    def u(k, shape, fan_in):
        bound = 1.0 / jnp.sqrt(float(fan_in))
        return jax.random.uniform(k, shape, jnp.float32, -bound, bound)

    d2 = D_DIM * D_DIM
    flat_dim = 256 * (D_DIM // 4) * (D_DIM // 4)
    return dict(
        emb=jax.random.normal(ks[0], (N_CLASSES, EMB_DIM), jnp.float32),
        w1=u(ks[1], (EMB_DIM, d2), EMB_DIM),
        b1=u(ks[2], (1, d2), EMB_DIM),
        cw1=u(ks[3], (128, 4, 3, 3), 4 * 9),
        cw2=u(ks[4], (256, 128, 3, 3), 128 * 9),
        gamma=1.0 + 0.5 * u(ks[5], (256,), 1),
        beta=0.1 * u(ks[6], (256,), 1),
        rm=jnp.zeros((256,), jnp.float32),
        rv=jnp.ones((256,), jnp.float32),
        wf=u(ks[7], (flat_dim, 1), flat_dim),
        bf=u(ks[8], (1, 1), flat_dim),
    )


# ---------------- pure-JAX reference (NCHW, lax.conv) ------------------------

def reference_forward(x, labels, params):
    B = x.shape[0]
    emb = params["emb"][labels]
    lab = (emb @ params["w1"] + params["b1"]).reshape(B, 1, D_DIM, D_DIM)
    h = jnp.concatenate([x, lab], axis=1)
    h = lax.conv_general_dilated(h, params["cw1"], (2, 2), ((1, 1), (1, 1)),
                                 dimension_numbers=("NCHW", "OIHW", "NCHW"))
    h = jnp.where(h > 0, h, 0.2 * h)
    h = lax.conv_general_dilated(h, params["cw2"], (2, 2), ((1, 1), (1, 1)),
                                 dimension_numbers=("NCHW", "OIHW", "NCHW"))
    scale = params["gamma"] / jnp.sqrt(params["rv"] + BN_EPS)
    shift = params["beta"] - params["rm"] * scale
    h = h * scale[None, :, None, None] + shift[None, :, None, None]
    h = jnp.where(h > 0, h, 0.2 * h)
    flat = h.reshape(B, -1)
    return jax.nn.sigmoid(flat @ params["wf"] + params["bf"])


if __name__ == "__main__":
    key = jax.random.PRNGKey(0)
    kparam, kx, kl = jax.random.split(key, 3)
    params = init_params(kparam)
    kp = prepare_params(params)        # one-time layout conversion ("load time")

    B = 2
    x = jax.random.normal(kx, (B, 3, D_DIM, D_DIM), jnp.float32)
    labels = jax.random.randint(kl, (B,), 0, N_CLASSES)

    out = jax.jit(cgan_discriminator_forward)(x, labels, kp)
    jax.block_until_ready(out)

    ref = reference_forward(x, labels, params)
    assert out.shape == (B, 1), out.shape
    assert jnp.allclose(out, ref, atol=1e-3, rtol=1e-3), (out, ref)
    print("KERNEL_OK")
</pallas_src>

<mosaic_0001>
module attributes {stable_mosaic.version = 11 : i64} {
  func.func @kernel(%arg0: i32, %arg1: memref<64x36xf32, #tpu.memory_space<vmem>>, %arg2: memref<36x128xf32, #tpu.memory_space<vmem>>, %arg3: memref<1152x256xf32, #tpu.memory_space<vmem>>, %arg4: memref<1x256xf32, #tpu.memory_space<vmem>>, %arg5: memref<1x256xf32, #tpu.memory_space<vmem>>, %arg6: memref<16x256xf32, #tpu.memory_space<vmem>>, %arg7: memref<1x1xf32, #tpu.memory_space<vmem>>, %arg8: memref<1x1x1xf32, #tpu.memory_space<vmem>>) attributes {dimension_semantics = [#tpu.dimension_semantics<parallel>], iteration_bounds = array<i64: 2>, scalar_prefetch = 0 : i64, scratch_operands = 0 : i64, tpu.core_type = #tpu.core_type<tc>, window_params = [{transform_indices = @transform_0, window_bounds = array<i64: 64, 36>}, {pipeline_mode = #tpu.pipeline_mode<synchronous>, transform_indices = @transform_1, window_bounds = array<i64: 36, 128>}, {pipeline_mode = #tpu.pipeline_mode<synchronous>, transform_indices = @transform_2, window_bounds = array<i64: 1152, 256>}, {pipeline_mode = #tpu.pipeline_mode<synchronous>, transform_indices = @transform_3, window_bounds = array<i64: 1, 256>}, {pipeline_mode = #tpu.pipeline_mode<synchronous>, transform_indices = @transform_4, window_bounds = array<i64: 1, 256>}, {pipeline_mode = #tpu.pipeline_mode<synchronous>, transform_indices = @transform_5, window_bounds = array<i64: 16, 256>}, {pipeline_mode = #tpu.pipeline_mode<synchronous>, transform_indices = @transform_6, window_bounds = array<i64: 1, 1>}, {transform_indices = @transform_7, window_bounds = array<i64: 1, 1, 1>}]} {
    %c0 = arith.constant 0 : index
    %c0_0 = arith.constant 0 : index
    %0 = vector.load %arg1[%c0, %c0_0] : memref<64x36xf32, #tpu.memory_space<vmem>>, vector<64x36xf32>
    %c0_1 = arith.constant 0 : index
    %c0_2 = arith.constant 0 : index
    %1 = vector.load %arg2[%c0_1, %c0_2] : memref<36x128xf32, #tpu.memory_space<vmem>>, vector<36x128xf32>
    %cst = arith.constant dense<0.000000e+00> : vector<64x128xf32>
    %2 = tpu.matmul %0, %1, %cst {dimension_numbers = #tpu.dot_dimension_numbers<[1], [0], [0], [1], [0, 0, 1, 1], [], []>} : vector<64x36xf32>, vector<36x128xf32>, vector<64x128xf32> -> vector<64x128xf32>
    %cst_3 = arith.constant 0.000000e+00 : f32
    %3 = vector.broadcast %cst_3 : f32 to vector<64x128xf32>
    %4 = arith.cmpf ogt, %2, %3 : vector<64x128xf32>
    %cst_4 = arith.constant 2.000000e-01 : f32
    %5 = vector.broadcast %cst_4 : f32 to vector<64x128xf32>
    %6 = arith.mulf %5, %2 : vector<64x128xf32>
    %7 = arith.select %4, %2, %6 : vector<64x128xi1>, vector<64x128xf32>
    %8 = tpu.iota {dimensions = array<i32: 0>} : vector<16x128xi32>
    %cst_5 = arith.constant 0.000000e+00 : f32
    %9 = vector.broadcast %cst_5 : f32 to vector<16x256xf32>
    %10 = vector.extract_strided_slice %7 {offsets = [43, 0], sizes = [16, 128], strides = [1, 1]} : vector<64x128xf32> to vector<16x128xf32>
    %c4_i32 = arith.constant 4 : i32
    %11 = vector.broadcast %c4_i32 : i32 to vector<16x128xi32>
    %12 = arith.cmpi sge, %8, %11 : vector<16x128xi32>
    %c4_i32_6 = arith.constant 4 : i32
    %c0_i32 = arith.constant 0 : i32
    %13 = arith.cmpi eq, %c4_i32_6, %c0_i32 : i32
    %c1_i32 = arith.constant 1 : i32
    %14 = arith.select %13, %c1_i32, %c4_i32_6 : i32
    %15 = vector.broadcast %14 : i32 to vector<16x128xi32>
    %16 = arith.remsi %8, %15 : vector<16x128xi32>
    %c0_i32_7 = arith.constant 0 : i32
    %17 = vector.broadcast %c0_i32_7 : i32 to vector<16x128xi32>
    %18 = arith.cmpi ne, %16, %17 : vector<16x128xi32>
    %c0_i32_8 = arith.constant 0 : i32
    %19 = vector.broadcast %c0_i32_8 : i32 to vector<16x128xi32>
    %20 = arith.cmpi slt, %16, %19 : vector<16x128xi32>
    %c0_i32_9 = arith.constant 0 : i32
    %21 = arith.cmpi slt, %14, %c0_i32_9 : i32
    %22 = vector.broadcast %21 : i1 to vector<16x128xi1>
    %23 = vector.broadcast %22 : vector<16x128xi1> to vector<16x128xi1>
    %24 = arith.xori %20, %23 : vector<16x128xi1>
    %25 = arith.andi %24, %18 : vector<16x128xi1>
    %26 = vector.broadcast %14 : i32 to vector<16x128xi32>
    %27 = arith.addi %16, %26 : vector<16x128xi32>
    %28 = arith.select %25, %27, %16 : vector<16x128xi1>, vector<16x128xi32>
    %c1_i32_10 = arith.constant 1 : i32
    %29 = vector.broadcast %c1_i32_10 : i32 to vector<16x128xi32>
    %30 = arith.cmpi sge, %28, %29 : vector<16x128xi32>
    %31 = arith.andi %12, %30 : vector<16x128xi1>
    %cst_11 = arith.constant 0.000000e+00 : f32
    %32 = vector.broadcast %cst_11 : f32 to vector<16x128xf32>
    %33 = arith.select %31, %10, %32 : vector<16x128xi1>, vector<16x128xf32>
    %c0_12 = arith.constant 0 : index
    %c0_13 = arith.constant 0 : index
    %34 = vector.load %arg3[%c0_12, %c0_13] : memref<1152x256xf32, #tpu.memory_space<vmem>>, vector<128x256xf32>
    %cst_14 = arith.constant dense<0.000000e+00> : vector<16x256xf32>
    %35 = tpu.matmul %33, %34, %cst_14 {dimension_numbers = #tpu.dot_dimension_numbers<[1], [0], [0], [1], [0, 0, 1, 1], [], []>} : vector<16x128xf32>, vector<128x256xf32>, vector<16x256xf32> -> vector<16x256xf32>
    %36 = arith.addf %9, %35 : vector<16x256xf32>
    %37 = vector.extract_strided_slice %7 {offsets = [28, 0], sizes = [16, 128], strides = [1, 1]} : vector<64x128xf32> to vector<16x128xf32>
    %c4_i32_15 = arith.constant 4 : i32
    %38 = vector.broadcast %c4_i32_15 : i32 to vector<16x128xi32>
    %39 = arith.cmpi sge, %8, %38 : vector<16x128xi32>
    %cst_16 = arith.constant 0.000000e+00 : f32
    %40 = vector.broadcast %cst_16 : f32 to vector<16x128xf32>
    %41 = arith.select %39, %37, %40 : vector<16x128xi1>, vector<16x128xf32>
    %c128 = arith.constant 128 : index
    %c0_17 = arith.constant 0 : index
    %42 = vector.load %arg3[%c128, %c0_17] : memref<1152x256xf32, #tpu.memory_space<vmem>>, vector<128x256xf32>
    %cst_18 = arith.constant dense<0.000000e+00> : vector<16x256xf32>
    %43 = tpu.matmul %41, %42, %cst_18 {dimension_numbers = #tpu.dot_dimension_numbers<[1], [0], [0], [1], [0, 0, 1, 1], [], []>} : vector<16x128xf32>, vector<128x256xf32>, vector<16x256xf32> -> vector<16x256xf32>
    %44 = arith.addf %36, %43 : vector<16x256xf32>
    %45 = vector.extract_strided_slice %7 {offsets = [44, 0], sizes = [16, 128], strides = [1, 1]} : vector<64x128xf32> to vector<16x128xf32>
    %c4_i32_19 = arith.constant 4 : i32
    %46 = vector.broadcast %c4_i32_19 : i32 to vector<16x128xi32>
    %47 = arith.cmpi sge, %8, %46 : vector<16x128xi32>
    %cst_20 = arith.constant 0.000000e+00 : f32
    %48 = vector.broadcast %cst_20 : f32 to vector<16x128xf32>
    %49 = arith.select %47, %45, %48 : vector<16x128xi1>, vector<16x128xf32>
    %c256 = arith.constant 256 : index
    %c0_21 = arith.constant 0 : index
    %50 = vector.load %arg3[%c256, %c0_21] : memref<1152x256xf32, #tpu.memory_space<vmem>>, vector<128x256xf32>
    %cst_22 = arith.constant dense<0.000000e+00> : vector<16x256xf32>
    %51 = tpu.matmul %49, %50, %cst_22 {dimension_numbers = #tpu.dot_dimension_numbers<[1], [0], [0], [1], [0, 0, 1, 1], [], []>} : vector<16x128xf32>, vector<128x256xf32>, vector<16x256xf32> -> vector<16x256xf32>
    %52 = arith.addf %44, %51 : vector<16x256xf32>
    %53 = vector.extract_strided_slice %7 {offsets = [15, 0], sizes = [16, 128], strides = [1, 1]} : vector<64x128xf32> to vector<16x128xf32>
    %c4_i32_23 = arith.constant 4 : i32
    %c0_i32_24 = arith.constant 0 : i32
    %54 = arith.cmpi eq, %c4_i32_23, %c0_i32_24 : i32
    %c1_i32_25 = arith.constant 1 : i32
    %55 = arith.select %54, %c1_i32_25, %c4_i32_23 : i32
    %56 = vector.broadcast %55 : i32 to vector<16x128xi32>
    %57 = arith.remsi %8, %56 : vector<16x128xi32>
    %c0_i32_26 = arith.constant 0 : i32
    %58 = vector.broadcast %c0_i32_26 : i32 to vector<16x128xi32>
    %59 = arith.cmpi ne, %57, %58 : vector<16x128xi32>
    %c0_i32_27 = arith.constant 0 : i32
    %60 = vector.broadcast %c0_i32_27 : i32 to vector<16x128xi32>
    %61 = arith.cmpi slt, %57, %60 : vector<16x128xi32>
    %c0_i32_28 = arith.constant 0 : i32
    %62 = arith.cmpi slt, %55, %c0_i32_28 : i32
    %63 = vector.broadcast %62 : i1 to vector<16x128xi1>
    %64 = vector.broadcast %63 : vector<16x128xi1> to vector<16x128xi1>
    %65 = arith.xori %61, %64 : vector<16x128xi1>
    %66 = arith.andi %65, %59 : vector<16x128xi1>
    %67 = vector.broadcast %55 : i32 to vector<16x128xi32>
    %68 = arith.addi %57, %67 : vector<16x128xi32>
    %69 = arith.select %66, %68, %57 : vector<16x128xi1>, vector<16x128xi32>
    %c1_i32_29 = arith.constant 1 : i32
    %70 = vector.broadcast %c1_i32_29 : i32 to vector<16x128xi32>
    %71 = arith.cmpi sge, %69, %70 : vector<16x128xi32>
    %cst_30 = arith.constant 0.000000e+00 : f32
    %72 = vector.broadcast %cst_30 : f32 to vector<16x128xf32>
    %73 = arith.select %71, %53, %72 : vector<16x128xi1>, vector<16x128xf32>
    %c384 = arith.constant 384 : index
    %c0_31 = arith.constant 0 : index
    %74 = vector.load %arg3[%c384, %c0_31] : memref<1152x256xf32, #tpu.memory_space<vmem>>, vector<128x256xf32>
    %cst_32 = arith.constant dense<0.000000e+00> : vector<16x256xf32>
    %75 = tpu.matmul %73, %74, %cst_32 {dimension_numbers = #tpu.dot_dimension_numbers<[1], [0], [0], [1], [0, 0, 1, 1], [], []>} : vector<16x128xf32>, vector<128x256xf32>, vector<16x256xf32> -> vector<16x256xf32>
    %76 = arith.addf %52, %75 : vector<16x256xf32>
    %77 = vector.extract_strided_slice %7 {offsets = [0, 0], sizes = [16, 128], strides = [1, 1]} : vector<64x128xf32> to vector<16x128xf32>
    %c512 = arith.constant 512 : index
    %c0_33 = arith.constant 0 : index
    %78 = vector.load %arg3[%c512, %c0_33] : memref<1152x256xf32, #tpu.memory_space<vmem>>, vector<128x256xf32>
    %cst_34 = arith.constant dense<0.000000e+00> : vector<16x256xf32>
    %79 = tpu.matmul %77, %78, %cst_34 {dimension_numbers = #tpu.dot_dimension_numbers<[1], [0], [0], [1], [0, 0, 1, 1], [], []>} : vector<16x128xf32>, vector<128x256xf32>, vector<16x256xf32> -> vector<16x256xf32>
    %80 = arith.addf %76, %79 : vector<16x256xf32>
    %81 = vector.extract_strided_slice %7 {offsets = [16, 0], sizes = [16, 128], strides = [1, 1]} : vector<64x128xf32> to vector<16x128xf32>
    %c640 = arith.constant 640 : index
    %c0_35 = arith.constant 0 : index
    %82 = vector.load %arg3[%c640, %c0_35] : memref<1152x256xf32, #tpu.memory_space<vmem>>, vector<128x256xf32>
    %cst_36 = arith.constant dense<0.000000e+00> : vector<16x256xf32>
    %83 = tpu.matmul %81, %82, %cst_36 {dimension_numbers = #tpu.dot_dimension_numbers<[1], [0], [0], [1], [0, 0, 1, 1], [], []>} : vector<16x128xf32>, vector<128x256xf32>, vector<16x256xf32> -> vector<16x256xf32>
    %84 = arith.addf %80, %83 : vector<16x256xf32>
    %85 = vector.extract_strided_slice %7 {offsets = [47, 0], sizes = [16, 128], strides = [1, 1]} : vector<64x128xf32> to vector<16x128xf32>
    %c4_i32_37 = arith.constant 4 : i32
    %c0_i32_38 = arith.constant 0 : i32
    %86 = arith.cmpi eq, %c4_i32_37, %c0_i32_38 : i32
    %c1_i32_39 = arith.constant 1 : i32
    %87 = arith.select %86, %c1_i32_39, %c4_i32_37 : i32
    %88 = vector.broadcast %87 : i32 to vector<16x128xi32>
    %89 = arith.remsi %8, %88 : vector<16x128xi32>
    %c0_i32_40 = arith.constant 0 : i32
    %90 = vector.broadcast %c0_i32_40 : i32 to vector<16x128xi32>
    %91 = arith.cmpi ne, %89, %90 : vector<16x128xi32>
    %c0_i32_41 = arith.constant 0 : i32
    %92 = vector.broadcast %c0_i32_41 : i32 to vector<16x128xi32>
    %93 = arith.cmpi slt, %89, %92 : vector<16x128xi32>
    %c0_i32_42 = arith.constant 0 : i32
    %94 = arith.cmpi slt, %87, %c0_i32_42 : i32
    %95 = vector.broadcast %94 : i1 to vector<16x128xi1>
    %96 = vector.broadcast %95 : vector<16x128xi1> to vector<16x128xi1>
    %97 = arith.xori %93, %96 : vector<16x128xi1>
    %98 = arith.andi %97, %91 : vector<16x128xi1>
    %99 = vector.broadcast %87 : i32 to vector<16x128xi32>
    %100 = arith.addi %89, %99 : vector<16x128xi32>
    %101 = arith.select %98, %100, %89 : vector<16x128xi1>, vector<16x128xi32>
    %c1_i32_43 = arith.constant 1 : i32
    %102 = vector.broadcast %c1_i32_43 : i32 to vector<16x128xi32>
    %103 = arith.cmpi sge, %101, %102 : vector<16x128xi32>
    %cst_44 = arith.constant 0.000000e+00 : f32
    %104 = vector.broadcast %cst_44 : f32 to vector<16x128xf32>
    %105 = arith.select %103, %85, %104 : vector<16x128xi1>, vector<16x128xf32>
    %c768 = arith.constant 768 : index
    %c0_45 = arith.constant 0 : index
    %106 = vector.load %arg3[%c768, %c0_45] : memref<1152x256xf32, #tpu.memory_space<vmem>>, vector<128x256xf32>
    %cst_46 = arith.constant dense<0.000000e+00> : vector<16x256xf32>
    %107 = tpu.matmul %105, %106, %cst_46 {dimension_numbers = #tpu.dot_dimension_numbers<[1], [0], [0], [1], [0, 0, 1, 1], [], []>} : vector<16x128xf32>, vector<128x256xf32>, vector<16x256xf32> -> vector<16x256xf32>
    %108 = arith.addf %84, %107 : vector<16x256xf32>
    %109 = vector.extract_strided_slice %7 {offsets = [32, 0], sizes = [16, 128], strides = [1, 1]} : vector<64x128xf32> to vector<16x128xf32>
    %c896 = arith.constant 896 : index
    %c0_47 = arith.constant 0 : index
    %110 = vector.load %arg3[%c896, %c0_47] : memref<1152x256xf32, #tpu.memory_space<vmem>>, vector<128x256xf32>
    %cst_48 = arith.constant dense<0.000000e+00> : vector<16x256xf32>
    %111 = tpu.matmul %109, %110, %cst_48 {dimension_numbers = #tpu.dot_dimension_numbers<[1], [0], [0], [1], [0, 0, 1, 1], [], []>} : vector<16x128xf32>, vector<128x256xf32>, vector<16x256xf32> -> vector<16x256xf32>
    %112 = arith.addf %108, %111 : vector<16x256xf32>
    %113 = vector.extract_strided_slice %7 {offsets = [48, 0], sizes = [16, 128], strides = [1, 1]} : vector<64x128xf32> to vector<16x128xf32>
    %c1024 = arith.constant 1024 : index
    %c0_49 = arith.constant 0 : index
    %114 = vector.load %arg3[%c1024, %c0_49] : memref<1152x256xf32, #tpu.memory_space<vmem>>, vector<128x256xf32>
    %cst_50 = arith.constant dense<0.000000e+00> : vector<16x256xf32>
    %115 = tpu.matmul %113, %114, %cst_50 {dimension_numbers = #tpu.dot_dimension_numbers<[1], [0], [0], [1], [0, 0, 1, 1], [], []>} : vector<16x128xf32>, vector<128x256xf32>, vector<16x256xf32> -> vector<16x256xf32>
    %116 = arith.addf %112, %115 : vector<16x256xf32>
    %c0_51 = arith.constant 0 : index
    %c0_52 = arith.constant 0 : index
    %117 = vector.load %arg4[%c0_51, %c0_52] : memref<1x256xf32, #tpu.memory_space<vmem>>, vector<1x256xf32>
    %118 = vector.broadcast %117 : vector<1x256xf32> to vector<16x256xf32>
    %119 = arith.mulf %116, %118 : vector<16x256xf32>
    %c0_53 = arith.constant 0 : index
    %c0_54 = arith.constant 0 : index
    %120 = vector.load %arg5[%c0_53, %c0_54] : memref<1x256xf32, #tpu.memory_space<vmem>>, vector<1x256xf32>
    %121 = vector.broadcast %120 : vector<1x256xf32> to vector<16x256xf32>
    %122 = arith.addf %119, %121 : vector<16x256xf32>
    %cst_55 = arith.constant 0.000000e+00 : f32
    %123 = vector.broadcast %cst_55 : f32 to vector<16x256xf32>
    %124 = arith.cmpf ogt, %122, %123 : vector<16x256xf32>
    %cst_56 = arith.constant 2.000000e-01 : f32
    %125 = vector.broadcast %cst_56 : f32 to vector<16x256xf32>
    %126 = arith.mulf %125, %122 : vector<16x256xf32>
    %127 = arith.select %124, %122, %126 : vector<16x256xi1>, vector<16x256xf32>
    %c0_57 = arith.constant 0 : index
    %c0_58 = arith.constant 0 : index
    %128 = vector.load %arg6[%c0_57, %c0_58] : memref<16x256xf32, #tpu.memory_space<vmem>>, vector<16x256xf32>
    %129 = arith.mulf %127, %128 : vector<16x256xf32>
    %cst_59 = arith.constant dense<0.000000e+00> : vector<16xf32>
    %130 = vector.multi_reduction <add>, %129, %cst_59 [1] : vector<16x256xf32> to vector<16xf32>
    %131 = vector.shape_cast %130 : vector<16xf32> to vector<16x1xf32>
    %cst_60 = arith.constant dense<0.000000e+00> : vector<1xf32>
    %132 = vector.multi_reduction <add>, %131, %cst_60 [0] : vector<16x1xf32> to vector<1xf32>
    %133 = vector.shape_cast %132 : vector<1xf32> to vector<1x1xf32>
    %c0_61 = arith.constant 0 : index
    %c0_62 = arith.constant 0 : index
    %134 = vector.load %arg7[%c0_61, %c0_62] : memref<1x1xf32, #tpu.memory_space<vmem>>, vector<1x1xf32>
    %135 = arith.addf %133, %134 : vector<1x1xf32>
    %136 = arith.negf %135 : vector<1x1xf32>
    %137 = math.exp %136 : vector<1x1xf32>
    %cst_63 = arith.constant 1.000000e+00 : f32
    %138 = vector.broadcast %cst_63 : f32 to vector<1x1xf32>
    %139 = arith.addf %138, %137 : vector<1x1xf32>
    %140 = arith.divf %138, %139 : vector<1x1xf32>
    %c0_64 = arith.constant 0 : index
    %c0_65 = arith.constant 0 : index
    %c0_66 = arith.constant 0 : index
    %141 = vector.load %arg8[%c0_64, %c0_65, %c0_66] : memref<1x1x1xf32, #tpu.memory_space<vmem>>, vector<1x1x1xf32>
    %142 = vector.shape_cast %141 : vector<1x1x1xf32> to vector<1x1xf32>
    %143 = vector.shape_cast %140 : vector<1x1xf32> to vector<1x1x1xf32>
    tpu.vector_store %arg8[%c0_64, %c0_65, %c0_66], %143 {strides = array<i32>} : memref<1x1x1xf32, #tpu.memory_space<vmem>>, vector<1x1x1xf32>,
    return
  }
  func.func @transform_0(%arg0: i32) -> (i32, i32) {
    %c0_i32 = arith.constant 0 : i32
    %c0_i32_0 = arith.constant 0 : i32
    return %arg0, %c0_i32 : i32, i32
  }
  func.func @transform_1(%arg0: i32) -> (i32, i32) {
    %c0_i32 = arith.constant 0 : i32
    %c0_i32_0 = arith.constant 0 : i32
    %c0_i32_1 = arith.constant 0 : i32
    return %c0_i32, %c0_i32_0 : i32, i32
  }
  func.func @transform_2(%arg0: i32) -> (i32, i32) {
    %c0_i32 = arith.constant 0 : i32
    %c0_i32_0 = arith.constant 0 : i32
    %c0_i32_1 = arith.constant 0 : i32
    return %c0_i32, %c0_i32_0 : i32, i32
  }
  func.func @transform_3(%arg0: i32) -> (i32, i32) {
    %c0_i32 = arith.constant 0 : i32
    %c0_i32_0 = arith.constant 0 : i32
    %c0_i32_1 = arith.constant 0 : i32
    return %c0_i32, %c0_i32_0 : i32, i32
  }
  func.func @transform_4(%arg0: i32) -> (i32, i32) {
    %c0_i32 = arith.constant 0 : i32
    %c0_i32_0 = arith.constant 0 : i32
    %c0_i32_1 = arith.constant 0 : i32
    return %c0_i32, %c0_i32_0 : i32, i32
  }
  func.func @transform_5(%arg0: i32) -> (i32, i32) {
    %c0_i32 = arith.constant 0 : i32
    %c0_i32_0 = arith.constant 0 : i32
    %c0_i32_1 = arith.constant 0 : i32
    return %c0_i32, %c0_i32_0 : i32, i32
  }
  func.func @transform_6(%arg0: i32) -> (i32, i32) {
    %c0_i32 = arith.constant 0 : i32
    %c0_i32_0 = arith.constant 0 : i32
    %c0_i32_1 = arith.constant 0 : i32
    return %c0_i32, %c0_i32_0 : i32, i32
  }
  func.func @transform_7(%arg0: i32) -> (i32, i32, i32) {
    %c0_i32 = arith.constant 0 : i32
    %c0_i32_0 = arith.constant 0 : i32
    %c0_i32_1 = arith.constant 0 : i32
    return %arg0, %c0_i32, %c0_i32_0 : i32, i32, i32
  }
}

</mosaic_0001>

<bundles_post_ra>
// kernel: cgan_discriminator_forward.1
= control target key start
LH: loop header
LB: loop body
LE: loop exit
PB: predicated region body
PF: predicated region fallthrough
CT: control target
= control target key end

     0   :  { %s1794_s26 = smov 0   ;;  %s2848_s0 = inlined_call_operand.vmem [shape: f32[128,36], index: 0, kind: input, shape index: {}]   ;;  %s2849_s1 = inlined_call_operand.vmem [shape: f32[36,128], index: 1, kind: input, shape index: {}]   ;;  %s2850_s2 = inlined_call_operand.vmem [shape: f32[1152,256], index: 2, kind: input, shape index: {}]   ;;  %s2851_s3 = inlined_call_operand.vmem [shape: f32[1,256], index: 3, kind: input, shape index: {}]   ;;  %s2852_s4 = inlined_call_operand.vmem [shape: f32[1,256], index: 4, kind: input, shape index: {}]   ;;  %s2853_s5 = inlined_call_operand.vmem [shape: f32[16,256], index: 5, kind: input, shape index: {}]   ;;  %s2854_s6 = inlined_call_operand.<no memory space> [shape: f32[1,1], index: 6, kind: input, shape index: {}]   ;;  %s2855_s7 = inlined_call_operand.vmem [shape: f32[2,1,1], index: 7, kind: output, shape index: {}]  }
   0x1   :  { %v12_v0 = vstv %s2854_s6 }
   0x2   :  { %13 = vst [vmem:[#allocation2] sm:$0x1] %v12_v0 }
   0x3 LB: > { %s1800_s27 = sadd.s32 4294967295, %s1748_s26   ;;  %p1671_p0 = scmp.ge.s32.totalorder %s1748_s26, 1  ;;  %s1748_s26 = sphi %s1794_s26, %s19_s26  }
   0x4   : > { %p240_p1 = scmp.lt.s32.totalorder %s1748_s26, 3 }
   0x6   : > { %p241_p2 = pnand %p1671_p0, %p240_p1 }
   0x7   : > { %s1672_s8 = sshll.u32 (!%p241_p2), %s1800_s27, 3  ;;  %p276_p4 = scmp.lt.s32.totalorder (!%p241_p2), %s1800_s27, 1 }
   0x8   : > { %244 = sbr.rel (%p241_p2) target bundleno = 772 (0x304), region = 48  ;;  %p271_p3 = scmp.lt.s32.totalorder (!%p241_p2), %s1672_s8, 15 }
   0xd   : > { %v291_v1 = vld [vmem:[%s2849_s1 + $0x20] sm:$0xf]  ;;  %vm317_vm0 = vcmask 1043456   ;;  %v290_v2 = vld [vmem:[%s2849_s1 + $0x18] sm:$0xff]  ;;  %v289_v3 = vld [vmem:[%s2849_s1 + $0x10] sm:$0xff]  ;;  %s2861_s8 = smov (!%p271_p3, %s1672_s8), 15 }
   0xe   : > { %1707 = vmatprep.subr.msk.mxu0 %vm317_vm0, %v291_v1  ;;  %v570_v4 = vld [vmem:[%s2850_s2 + $0x1f8] sm:$0xff]  ;;  %v569_v5 = vld [vmem:[%s2850_s2 + $0x1f0] sm:$0xff]  ;;  %v568_v6 = vld [vmem:[%s2850_s2 + $0x1e8] sm:$0xff]  ;;  %s1673_s25 = sshll.u32 %s2861_s8, 3  ;;  %vm292_vm1 = vcmask 293888   ;;  %vm486_vm9 = vcmask 1044480  }
   0xf   : > { %1708 = vmatpush3.msk.msra.mxu0 %vm317_vm0, %v291_v1  ;;  %571 = vmatprep.subr.mxu1 %v570_v4  ;;  %v567_v7 = vld [vmem:[%s2850_s2 + $0x1e0] sm:$0xff]  ;;  %v566_v8 = vld [vmem:[%s2850_s2 + $0x1d8] sm:$0xff]  ;;  %v288_v9 = vld [vmem:[%s2849_s1 + $0x8] sm:$0xff]  ;;  %s1843_s9 = scalar_lea.vmem %s2848_s0, %s1673_s25  ;;  %vm848_vm14 = vcmask 1040384   ;;  %s2863_s27 = smov (!%p276_p4, %s1800_s27), 1 }
  0x10   : > { %1709 = vmatprep.subr.mxu0 %v290_v2  ;;  %572 = vmatpush1.msra.mxu1 %v569_v5  ;;  %v565_v10 = vld [vmem:[%s2850_s2 + $0x1d0] sm:$0xff]  ;;  %v287_v11 = vld [vmem:[%s2849_s1] sm:$0xff]  ;;  %v564_v12 = vld [vmem:[%s2850_s2 + $0x1c8] sm:$0xff]  ;;  %s278_s16 = scalar_lea.vmem %s2855_s7, %s2863_s27 }
  0x11   : > { %1710 = vmatpush3.msra.mxu0 %v290_v2  ;;  %573 = vmatprep.subr.mxu1 %v568_v6  ;;  %v279_v13 = vld [vmem:[%s1843_s9] sm:$0xff]  ;;  %v280_v15 = vld [vmem:[%s1843_s9 + $0x8] sm:$0xff]  ;;  %v527_v16 = vld [vmem:[%s2850_s2 + $0xf8] sm:$0xff] }
  0x12   : > { %1711 = vmatprep.subr.mxu0 %v289_v3  ;;  %574 = vmatpush1.msra.mxu1 %v567_v7  ;;  %v563_v14 = vld [vmem:[%s2850_s2 + $0x1c0] sm:$0xff]  ;;  %v281_v17 = vld [vmem:[%s1843_s9 + $0x10] sm:$0xff]  ;;  %v525_v19 = vld [vmem:[%s2850_s2 + $0xe8] sm:$0xff] }
  0x13   : > { %1712 = vmatpush3.msra.mxu0 %v289_v3  ;;  %575 = vmatprep.subr.mxu1 %v566_v8  ;;  %v526_v18 = vld [vmem:[%s2850_s2 + $0xf0] sm:$0xff]  ;;  %v562_v20 = vld [vmem:[%s2850_s2 + $0x1b8] sm:$0xff]  ;;  %v524_v21 = vld [vmem:[%s2850_s2 + $0xe0] sm:$0xff] }
  0x14   : > { %1713 = vmatprep.subr.mxu0 %v288_v9  ;;  %576 = vmatpush1.msra.mxu1 %v565_v10  ;;  %v561_v22 = vld [vmem:[%s2850_s2 + $0x1b0] sm:$0xff]  ;;  %v282_v23 = vld [vmem:[%s1843_s9 + $0x18] sm:$0xff]  ;;  %v283_v25 = vld [vmem:[%s1843_s9 + $0x20] sm:$0xff] }
  0x15   : > { %1714 = vmatpush3.msra.mxu0 %v288_v9  ;;  %1717 = vmatprep.mubr.msk.f32.mxu0 %vm292_vm1, %v279_v13  ;;  %v523_v24 = vld [vmem:[%s2850_s2 + $0xd8] sm:$0xff]  ;;  %v522_v26 = vld [vmem:[%s2850_s2 + $0xd0] sm:$0xff]  ;;  %v560_v27 = vld [vmem:[%s2850_s2 + $0x1a8] sm:$0xff] }
  0x16   : > { %1715 = vmatprep.subr.mxu0 %v287_v11  ;;  %577 = vmatprep.subr.mxu1 %v564_v12  ;;  %v521_v28 = vld [vmem:[%s2850_s2 + $0xc8] sm:$0xff]  ;;  %v559_v29 = vld [vmem:[%s2850_s2 + $0x1a0] sm:$0xff]  ;;  %v558_v32 = vld [vmem:[%s2850_s2 + $0x198] sm:$0xff]  ;;  %v1750_v12 = vmov 0.0  }
  0x17   : > { %1716 = vmatpush3.msra.mxu0 %v287_v11  ;;  %578 = vmatpush1.msra.mxu1 %v563_v14  ;;  %v520_v30 = vld [vmem:[%s2850_s2 + $0xc0] sm:$0xff]  ;;  %v284_v31 = vld [vmem:[%s1843_s9 + $0x28] sm:$0xff]  ;;  %v285_v33 = vld [vmem:[%s1843_s9 + $0x30] sm:$0xff] }
  0x18   : > { %1718 = vmatmul.mubr.msk.f32.vlgmr.msra.gmra.mxu0 %vm292_vm1, %v280_v15  ;;  %648 = vmatprep.subr.mxu0 %v527_v16  ;;  %v519_v34 = vld [vmem:[%s2850_s2 + $0xb8] sm:$0xff]  ;;  %v557_v35 = vld [vmem:[%s2850_s2 + $0x190] sm:$0xff]  ;;  %v556_v37 = vld [vmem:[%s2850_s2 + $0x188] sm:$0xff] }
  0x19   : > { %1720 = vmatprep.mubr.msk.f32.mxu0 %vm292_vm1, %v281_v17  ;;  %649 = vmatpush1.msra.mxu0 %v526_v18  ;;  %v518_v36 = vld [vmem:[%s2850_s2 + $0xb0] sm:$0xff]  ;;  %v517_v38 = vld [vmem:[%s2850_s2 + $0xa8] sm:$0xff]  ;;  %v286_v39 = vld [vmem:[%s1843_s9 + $0x38] sm:$0xff] }
  0x1a   : > { %650 = vmatprep.subr.mxu0 %v525_v19  ;;  %579 = vmatprep.subr.mxu1 %v562_v20  ;;  %v555_v40 = vld [vmem:[%s2850_s2 + $0x180] sm:$0xff]  ;;  %v554_v42 = vld [vmem:[%s2850_s2 + $0x178] sm:$0xff]  ;;  %v553_v44 = vld [vmem:[%s2850_s2 + $0x170] sm:$0xff]  ;;  %v450_v20 = vlaneseq }
  0x1b   : > { %651 = vmatpush1.msra.mxu0 %v524_v21  ;;  %580 = vmatpush1.msra.mxu1 %v561_v22  ;;  %v516_v41 = vld [vmem:[%s2850_s2 + $0xa0] sm:$0xff]  ;;  %v515_v43 = vld [vmem:[%s2850_s2 + $0x98] sm:$0xff]  ;;  %v514_v45 = vld [vmem:[%s2850_s2 + $0x90] sm:$0xff] }
  0x1c   : > { %1721 = vmatmul.mubr.msk.f32.gmra.mxu0 %vm292_vm1, %v282_v23  ;;  %652 = vmatprep.subr.mxu0 %v523_v24  ;;  %v552_v46 = vld [vmem:[%s2850_s2 + $0x168] sm:$0xff]  ;;  %v551_v48 = vld [vmem:[%s2850_s2 + $0x160] sm:$0xff]  ;;  %v550_v50 = vld [vmem:[%s2850_s2 + $0x158] sm:$0xff]  ;;  %v2049_v24 = vshrl.u32 %v450_v20, 7 }
  0x1d   : > { %1723 = vmatprep.mubr.msk.f32.mxu0 %vm292_vm1, %v283_v25  ;;  %653 = vmatpush1.msra.mxu0 %v522_v26  ;;  %v513_v47 = vld [vmem:[%s2850_s2 + $0x88] sm:$0xff]  ;;  %v512_v49 = vld [vmem:[%s2850_s2 + $0x80] sm:$0xff]  ;;  %v511_v51 = vld [vmem:[%s2850_s2 + $0x78] sm:$0xff] }
  0x1e   : > { %581 = vmatprep.subr.mxu1 %v560_v27  ;;  %654 = vmatprep.subr.mxu0 %v521_v28  ;;  %v549_v52 = vld [vmem:[%s2850_s2 + $0x150] sm:$0xff]  ;;  %v548_v54 = vld [vmem:[%s2850_s2 + $0x148] sm:$0xff]  ;;  %v547_v56 = vld [vmem:[%s2850_s2 + $0x140] sm:$0xff]  ;;  %vm453_vm6 = vcmp.ge.s32.totalorder %v2049_v24, 4 }
  0x1f   : > { %582 = vmatpush1.msra.mxu1 %v559_v29  ;;  %655 = vmatpush1.msra.mxu0 %v520_v30  ;;  %v510_v53 = vld [vmem:[%s2850_s2 + $0x70] sm:$0xff]  ;;  %v509_v55 = vld [vmem:[%s2850_s2 + $0x68] sm:$0xff]  ;;  %v508_v57 = vld [vmem:[%s2850_s2 + $0x60] sm:$0xff]  ;;  %v459_v30 = vand.u32 3, %v2049_v24 }
  0x20   : > { %1724 = vmatmul.mubr.msk.f32.gmra.mxu0 %vm292_vm1, %v284_v31  ;;  %583 = vmatprep.subr.mxu1 %v558_v32  ;;  %v546_v58 = vld [vmem:[%s2850_s2 + $0x138] sm:$0xff]  ;;  %v545_v60 = vld [vmem:[%s2850_s2 + $0x130] sm:$0xff]  ;;  %v544_v62 = vld [vmem:[%s2850_s2 + $0x128] sm:$0xff] }
  0x21   : > { %1726 = vmatprep.mubr.msk.f32.mxu0 %vm292_vm1, %v285_v33  ;;  %656 = vmatprep.subr.mxu0 %v519_v34  ;;  %v507_v59 = vld [vmem:[%s2850_s2 + $0x58] sm:$0xff]  ;;  %v506_v61 = vld [vmem:[%s2850_s2 + $0x50] sm:$0xff]  ;;  %v505_v63 = vld [vmem:[%s2850_s2 + $0x48] sm:$0xff]  ;;  %vm2064_vm8 = vcmp.ge.s32.totalorder %v459_v30, 1 }
  0x22   : > { %584 = vmatpush1.msra.mxu1 %v557_v35  ;;  %657 = vmatpush1.msra.mxu0 %v518_v36  ;;  %v543_v0 = vld [vmem:[%s2850_s2 + $0x120] sm:$0xff]  ;;  %v542_v2 = vld [vmem:[%s2850_s2 + $0x118] sm:$0xff]  ;;  %v541_v4 = vld [vmem:[%s2850_s2 + $0x110] sm:$0xff] }
  0x23   : > { %585 = vmatprep.subr.mxu1 %v556_v37  ;;  %658 = vmatprep.subr.mxu0 %v517_v38  ;;  %v504_v1 = vld [vmem:[%s2850_s2 + $0x40] sm:$0xff]  ;;  %v503_v3 = vld [vmem:[%s2850_s2 + $0x38] sm:$0xff]  ;;  %v502_v5 = vld [vmem:[%s2850_s2 + $0x30] sm:$0xff] }
  0x24   : > { %1727 = vmatmul.mubr.msk.f32.gmra.mxu0 %vm292_vm1, %v286_v39  ;;  %586 = vmatpush1.msra.mxu1 %v555_v40  ;;  %v540_v6 = vld [vmem:[%s2850_s2 + $0x108] sm:$0xff]  ;;  %v539_v8 = vld [vmem:[%s2850_s2 + $0x100] sm:$0xff]  ;;  %v499_v10 = vld [vmem:[%s2850_s2 + $0x18] sm:$0xff] }
  0x25   : > { %659 = vmatpush1.msra.mxu0 %v516_v41  ;;  %587 = vmatprep.subr.mxu1 %v554_v42  ;;  %v501_v7 = vld [vmem:[%s2850_s2 + $0x28] sm:$0xff]  ;;  %v500_v9 = vld [vmem:[%s2850_s2 + $0x20] sm:$0xff]  ;;  %v764_v11 = vld [vmem:[%s2850_s2 + $0x2f8] sm:$0xff]  ;;  %v452_v42 = vadd.s32 8, %v2049_v24 }
  0x26   : > { %660 = vmatprep.subr.mxu0 %v515_v43  ;;  %588 = vmatpush1.msra.mxu1 %v553_v44  ;;  %v498_v13 = vld [vmem:[%s2850_s2 + $0x10] sm:$0xff]  ;;  %v497_v14 = vld [vmem:[%s2850_s2 + $0x8] sm:$0xff]  ;;  %v496_v15 = vld [vmem:[%s2850_s2] sm:$0xff] }
  0x27   : > { %661 = vmatpush1.msra.mxu0 %v514_v45  ;;  %589 = vmatprep.subr.mxu1 %v552_v46  ;;  %v889_v16 = vld [vmem:[%s2850_s2 + $0x3f8] sm:$0xff]  ;;  %v763_v38 = vld [vmem:[%s2850_s2 + $0x2f0] sm:$0xff]  ;;  %v762_v41 = vld [vmem:[%s2850_s2 + $0x2e8] sm:$0xff] }
  0x28   : > { %662 = vmatprep.subr.mxu0 %v513_v47  ;;  %590 = vmatpush1.msra.mxu1 %v551_v48  ;;  %v761_v45 = vld [vmem:[%s2850_s2 + $0x2e0] sm:$0xff]  ;;  %v760_v48 = vld [vmem:[%s2850_s2 + $0x2d8] sm:$0xff]  ;;  %vm481_vm10 = vmand %vm453_vm6, %vm2064_vm8 }
  0x29   : > { %663 = vmatpush1.msra.mxu0 %v512_v49  ;;  %591 = vmatprep.subr.mxu1 %v550_v50  ;;  %v759_v50 = vld [vmem:[%s2850_s2 + $0x2d0] sm:$0xff]  ;;  %v1460_v39 = vld [vmem:[%s2850_s2 + $0x8e0] sm:$0xff] }
  0x2a   : > { %664 = vmatprep.subr.mxu0 %v511_v51  ;;  %592 = vmatpush1.msra.mxu1 %v549_v52  ;;  %v876_v20 = vld [vmem:[%s2850_s2 + $0x390] sm:$0xff] }
  0x2b   : > { %665 = vmatpush1.msra.mxu0 %v510_v53  ;;  %593 = vmatprep.subr.mxu1 %v548_v54  ;;  %v888_v54 = vld [vmem:[%s2850_s2 + $0x3f0] sm:$0xff] }
  0x2c   : > { %666 = vmatprep.subr.mxu0 %v509_v55  ;;  %594 = vmatpush1.msra.mxu1 %v547_v56  ;;  %v758_v55 = vld [vmem:[%s2850_s2 + $0x2c8] sm:$0xff]  ;;  %v466_v56 = vand.u32 3, %v452_v42  ;;  %v743_v30 = vld [vmem:[%s2850_s2 + $0x250] sm:$0xff] }
  0x2d   : > { %667 = vmatpush1.msra.mxu0 %v508_v57  ;;  %595 = vmatprep.subr.mxu1 %v546_v58  ;;  %v887_v57 = vld [vmem:[%s2850_s2 + $0x3e8] sm:$0xff]  ;;  %v757_v58 = vld [vmem:[%s2850_s2 + $0x2c0] sm:$0xff]  ;;  %v868_v42 = vld [vmem:[%s2850_s2 + $0x350] sm:$0xff] }
  0x2e   : > { %668 = vmatprep.subr.mxu0 %v507_v59  ;;  %596 = vmatpush1.msra.mxu1 %v545_v60  ;;  %v886_v59 = vld [vmem:[%s2850_s2 + $0x3e0] sm:$0xff]  ;;  %v756_v60 = vld [vmem:[%s2850_s2 + $0x2b8] sm:$0xff]  ;;  %vm2122_vm11 = vcmp.ge.s32.totalorder %v466_v56, 1 }
  0x2f   : > { %669 = vmatpush1.msra.mxu0 %v506_v61  ;;  %597 = vmatprep.subr.mxu1 %v544_v62  ;;  %v885_v61 = vld [vmem:[%s2850_s2 + $0x3d8] sm:$0xff]  ;;  %v1453_v62 = vld [vmem:[%s2850_s2 + $0x8a8] sm:$0xff] }
  0x30   : > { %670 = vmatprep.subr.mxu0 %v505_v63  ;;  %598 = vmatpush1.msra.mxu1 %v543_v0  ;;  %v755_v0 = vld [vmem:[%s2850_s2 + $0x2b0] sm:$0xff] }
  0x31   : > { %671 = vmatpush1.msra.mxu0 %v504_v1  ;;  %599 = vmatprep.subr.mxu1 %v542_v2  ;;  %v884_v1 = vld [vmem:[%s2850_s2 + $0x3d0] sm:$0xff]  ;;  %v754_v2 = vld [vmem:[%s2850_s2 + $0x2a8] sm:$0xff] }
  0x32   : > { %672 = vmatprep.subr.mxu0 %v503_v3  ;;  %600 = vmatpush1.msra.mxu1 %v541_v4  ;;  %v883_v3 = vld [vmem:[%s2850_s2 + $0x3c8] sm:$0xff]  ;;  %v753_v4 = vld [vmem:[%s2850_s2 + $0x2a0] sm:$0xff] }
  0x33   : > { %673 = vmatpush1.msra.mxu0 %v502_v5  ;;  %601 = vmatprep.subr.mxu1 %v540_v6  ;;  %v882_v5 = vld [vmem:[%s2850_s2 + $0x3c0] sm:$0xff]  ;;  %v752_v6 = vld [vmem:[%s2850_s2 + $0x298] sm:$0xff] }
  0x34   : > { %674 = vmatprep.subr.mxu0 %v501_v7  ;;  %602 = vmatpush1.msra.mxu1 %v539_v8  ;;  %v881_v7 = vld [vmem:[%s2850_s2 + $0x3b8] sm:$0xff]  ;;  %v751_v8 = vld [vmem:[%s2850_s2 + $0x290] sm:$0xff] }
  0x35   : > { %675 = vmatpush1.msra.mxu0 %v500_v9  ;;  %635 = vmatprep.mubr.f32.mxu1 %v1750_v12  ;;  %v880_v9 = vld [vmem:[%s2850_s2 + $0x3b0] sm:$0xff] }
  0x36   : > { %676 = vmatprep.subr.mxu0 %v499_v10  ;;  %765 = vmatprep.subr.mxu1 %v764_v11  ;;  %v750_v10 = vld [vmem:[%s2850_s2 + $0x288] sm:$0xff] }
  0x37   : > { %677 = vmatpush1.msra.mxu0 %v498_v13  ;;  %712 = vmatprep.mubr.f32.mxu0 %v1750_v12  ;;  %v879_v11 = vld [vmem:[%s2850_s2 + $0x3a8] sm:$0xff]  ;;  %v749_v13 = vld [vmem:[%s2850_s2 + $0x280] sm:$0xff] }
  0x38   : > { %678 = vmatprep.subr.mxu0 %v497_v14  ;;  %v878_v14 = vld [vmem:[%s2850_s2 + $0x3a0] sm:$0xff] }
  0x39   : > { %679 = vmatpush1.msra.mxu0 %v496_v15  ;;  %v748_v15 = vld [vmem:[%s2850_s2 + $0x278] sm:$0xff] }
  0x3a   : > { %890 = vmatprep.subr.mxu0 %v889_v16  ;;  %v877_v16 = vld [vmem:[%s2850_s2 + $0x398] sm:$0xff] }
  0xd8   : > { %v2043_v17 = vpop.f32.mrf.mxu0 }
  0xd9   : > { %v435_v56 = vmul.f32 0.2, %v2043_v17  ;;  %vm427_vm13 = vcmp.gt.f32.partialorder %v2043_v17, 0.0 }
  0xda   : > { %v2045_v18 = vpop.f32.mrf.mxu0 }
  0xdb   : > { %vm426_vm15 = vcmp.gt.f32.partialorder %v2045_v18, 0.0 }
  0xdc   : > { %v1722_v19 = vpop.f32.mrf.mxu0 }
  0xdd   : > { %v437_v22 = vmul.f32 0.2, %v1722_v19  ;;  %vm429_vm2 = vcmp.gt.f32.partialorder %v1722_v19, 0.0 }
  0xde   : > { %v2047_v21 = vpop.f32.mrf.mxu0 }
  0xdf   : > { %v2051_v26 = vsel %vm429_vm2, %v1722_v19, %v437_v22  ;;  %v747_v19 = vld [vmem:[%s2850_s2 + $0x270] sm:$0xff]  ;;  %v746_v22 = vld [vmem:[%s2850_s2 + $0x268] sm:$0xff]  ;;  %vm428_vm12 = vcmp.gt.f32.partialorder %v2047_v21, 0.0 }
  0xe0   : > { %v1725_v23 = vpop.f32.mrf.mxu0  ;;  %v530_v33 = vrot.slane %v2051_v26, 4 }
  0xe1   : > { %v439_v27 = vmul.f32 0.2, %v1725_v23  ;;  %vm431_vm4 = vcmp.gt.f32.partialorder %v1725_v23, 0.0 }
  0xe2   : > { %v407_v25 = vpop.f32.mrf.mxu0 }
  0xe3   : > { %vm430_vm3 = vcmp.gt.f32.partialorder %v407_v25, 0.0  ;;  %v438_v28 = vmul.f32 0.2, %v407_v25  ;;  %v2059_v36 = vsel %vm431_vm4, %v1725_v23, %v439_v27  ;;  %v875_v23 = vld [vmem:[%s2850_s2 + $0x388] sm:$0xff]  ;;  %v874_v27 = vld [vmem:[%s2850_s2 + $0x380] sm:$0xff]  ;;  %vm1618_vm4 = vcmask 0  }
  0xe4   : > { %v1728_v29 = vpop.f32.mrf.mxu0  ;;  %v487_v46 = vrot.slane %v2059_v36, 3  ;;  %v533_v49 = vrot.slane %v2059_v36, 4 }
  0xe5   : > { %v2054_v31 = vsel %vm430_vm3, %v407_v25, %v438_v28  ;;  %v441_v32 = vmul.f32 0.2, %v1728_v29  ;;  %vm433_vm5 = vcmp.gt.f32.partialorder %v1728_v29, 0.0  ;;  %v745_v25 = vld [vmem:[%s2850_s2 + $0x260] sm:$0xff]  ;;  %v744_v28 = vld [vmem:[%s2850_s2 + $0x258] sm:$0xff] }
  0xe6   : > { %v531_v34 = vrot.slane %v2054_v31, 4  ;;  %v417_v35 = vpop.f32.mrf.mxu0 }
  0xe7   : > { %vm432_vm7 = vcmp.gt.f32.partialorder %v417_v35, 0.0  ;;  %v440_v37 = vmul.f32 0.2, %v417_v35  ;;  %v2073_v43 = vsel %vm433_vm5, %v1728_v29, %v441_v32  ;;  %v873_v29 = vld [vmem:[%s2850_s2 + $0x378] sm:$0xff]  ;;  %v872_v32 = vld [vmem:[%s2850_s2 + $0x370] sm:$0xff] }
  0xe8   : > { %v532_v40 = vsel %vm317_vm0, %v530_v33, %v531_v34  ;;  %v490_v51 = vrot.slane %v2073_v43, 3  ;;  %v534_v52 = vsel %vm317_vm0, %v531_v34, %v533_v49  ;;  %v742_v33 = vld [vmem:[%s2850_s2 + $0x248] sm:$0xff] }
  0xe9   : > { %v2075_v44 = vsel %vm432_vm7, %v417_v35, %v440_v37  ;;  %1683 = vmatmul.mubr.msk.f32.vlgmr.msra.gmra.mxu1 %vm453_vm6, %v532_v40  ;;  %v871_v34 = vld [vmem:[%s2850_s2 + $0x368] sm:$0xff]  ;;  %v741_v35 = vld [vmem:[%s2850_s2 + $0x240] sm:$0xff]  ;;  %v869_v40 = vld [vmem:[%s2850_s2 + $0x358] sm:$0xff] }
  0xea   : > { %v488_v47 = vrot.slane %v2075_v44, 3  ;;  %766 = vmatpush1.msra.mxu1 %v763_v38  ;;  %641 = vmatprep.mubr.f32.mxu1 %v1750_v12  ;;  %v870_v37 = vld [vmem:[%s2850_s2 + $0x360] sm:$0xff]  ;;  %v740_v38 = vld [vmem:[%s2850_s2 + $0x238] sm:$0xff] }
  0xeb   : > { %767 = vmatprep.subr.mxu1 %v762_v41  ;;  %v739_v41 = vld [vmem:[%s2850_s2 + $0x230] sm:$0xff] }
  0xec   : > { %768 = vmatpush1.msra.mxu1 %v761_v45  ;;  %v489_v53 = vsel %vm486_vm9, %v487_v46, %v488_v47  ;;  %v491_v63 = vsel %vm486_vm9, %v488_v47, %v490_v51  ;;  %v738_v45 = vld [vmem:[%s2850_s2 + $0x228] sm:$0xff]  ;;  %v737_v47 = vld [vmem:[%s2850_s2 + $0x220] sm:$0xff]  ;;  %v436_v51 = vmul.f32 0.2, %v2047_v21 }
  0xed   : > { %769 = vmatprep.subr.mxu1 %v760_v48  ;;  %642 = vmatmul.mubr.f32.gmra.mxu1 %v534_v52  ;;  %v867_v46 = vld [vmem:[%s2850_s2 + $0x348] sm:$0xff]  ;;  %v866_v48 = vld [vmem:[%s2850_s2 + $0x340] sm:$0xff]  ;;  %v865_v52 = vld [vmem:[%s2850_s2 + $0x338] sm:$0xff] }
  0xee   : > { %1684 = vmatmul.mubr.msk.f32.vlgmr.msra.gmra.mxu0 %vm481_vm10, %v489_v53  ;;  %770 = vmatpush1.msra.mxu1 %v759_v50  ;;  %v736_v50 = vld [vmem:[%s2850_s2 + $0x218] sm:$0xff]  ;;  %v735_v53 = vld [vmem:[%s2850_s2 + $0x210] sm:$0xff] }
  0xef   : > { %891 = vmatpush1.msra.mxu0 %v888_v54  ;;  %771 = vmatprep.subr.mxu1 %v758_v55  ;;  %v864_v54 = vld [vmem:[%s2850_s2 + $0x330] sm:$0xff]  ;;  %v734_v55 = vld [vmem:[%s2850_s2 + $0x208] sm:$0xff] }
  0xf0   : > { %892 = vmatprep.subr.mxu0 %v887_v57  ;;  %772 = vmatpush1.msra.mxu1 %v757_v58  ;;  %v725_v57 = vrot.slane %v2075_v44, 4  ;;  %v863_v58 = vld [vmem:[%s2850_s2 + $0x328] sm:$0xff] }
  0xf1   : > { %893 = vmatpush1.msra.mxu0 %v886_v59  ;;  %718 = vmatprep.mubr.f32.mxu0 %v1750_v12  ;;  %v733_v59 = vld [vmem:[%s2850_s2 + $0x200] sm:$0xff] }
  0xf2   : > { %773 = vmatprep.subr.mxu1 %v756_v60  ;;  %894 = vmatprep.subr.mxu0 %v885_v61  ;;  %v862_v60 = vld [vmem:[%s2850_s2 + $0x320] sm:$0xff]  ;;  %v2274_v61 = vsel %vm428_vm12, %v2047_v21, %v436_v51  ;;  %v726_v21 = vsel %vm317_vm0, %v533_v49, %v725_v57  ;;  %v985_v51 = vld [vmem:[%s2850_s2 + $0x470] sm:$0xff] }
  0xf3   : > { %1685 = vmatmul.mubr.msk.f32.gmra.mxu0 %vm2122_vm11, %v491_v63  ;;  %774 = vmatpush1.msra.mxu1 %v755_v0  ;;  %v861_v63 = vld [vmem:[%s2850_s2 + $0x318] sm:$0xff]  ;;  %v858_v49 = vld [vmem:[%s2850_s2 + $0x300] sm:$0xff] }
  0xf4   : > { %895 = vmatpush1.msra.mxu0 %v884_v1  ;;  %775 = vmatprep.subr.mxu1 %v754_v2  ;;  %v1002_v0 = vld [vmem:[%s2850_s2 + $0x4f8] sm:$0xff]  ;;  %v860_v1 = vld [vmem:[%s2850_s2 + $0x310] sm:$0xff]  ;;  %v2286_v2 = vsel %vm427_vm13, %v2043_v17, %v435_v56  ;;  %v1000_v17 = vld [vmem:[%s2850_s2 + $0x4e8] sm:$0xff] }
  0xf5   : > { %896 = vmatprep.subr.mxu0 %v883_v3  ;;  %776 = vmatpush1.msra.mxu1 %v753_v4  ;;  %v1001_v3 = vld [vmem:[%s2850_s2 + $0x4f0] sm:$0xff]  ;;  %v859_v4 = vld [vmem:[%s2850_s2 + $0x308] sm:$0xff]  ;;  %v1100_v56 = vld [vmem:[%s2850_s2 + $0x580] sm:$0xff] }
  0xf6   : > { %897 = vmatpush1.msra.mxu0 %v882_v5  ;;  %777 = vmatprep.subr.mxu1 %v752_v6  ;;  %v850_v5 = vrot.slane %v2274_v61, 7  ;;  %v727_v6 = vrot.slane %v2073_v43, 4 }
  0xf7   : > { %898 = vmatprep.subr.mxu0 %v881_v7  ;;  %778 = vmatpush1.msra.mxu1 %v751_v8  ;;  %v849_v7 = vrot.slane %v2286_v2, 7  ;;  %v999_v8 = vld [vmem:[%s2850_s2 + $0x4e0] sm:$0xff] }
  0xf8   : > { %899 = vmatpush1.msra.mxu0 %v880_v9  ;;  %779 = vmatprep.subr.mxu1 %v750_v10  ;;  %v998_v9 = vld [vmem:[%s2850_s2 + $0x4d8] sm:$0xff] }
  0xf9   : > { %900 = vmatprep.subr.mxu0 %v879_v11  ;;  %780 = vmatpush1.msra.mxu1 %v749_v13  ;;  %v851_v10 = vsel %vm848_vm14, %v849_v7, %v850_v5  ;;  %v1115_v11 = vld [vmem:[%s2850_s2 + $0x5f8] sm:$0xff]  ;;  %v997_v13 = vld [vmem:[%s2850_s2 + $0x4d0] sm:$0xff]  ;;  %v975_v7 = vld [vmem:[%s2850_s2 + $0x420] sm:$0xff] }
  0xfa   : > { %901 = vmatpush1.msra.mxu0 %v878_v14  ;;  %781 = vmatprep.subr.mxu1 %v748_v15  ;;  %v728_v14 = vsel %vm317_vm0, %v725_v57, %v727_v6  ;;  %v1114_v15 = vld [vmem:[%s2850_s2 + $0x5f0] sm:$0xff]  ;;  %v982_v57 = vld [vmem:[%s2850_s2 + $0x458] sm:$0xff]  ;;  %v1093_v6 = vld [vmem:[%s2850_s2 + $0x548] sm:$0xff] }
  0xfb   : > { %902 = vmatprep.subr.mxu0 %v877_v16  ;;  %782 = vmatpush1.msra.mxu1 %v747_v19  ;;  %v996_v16 = vld [vmem:[%s2850_s2 + $0x4c8] sm:$0xff] }
  0xfc   : > { %903 = vmatpush1.msra.mxu0 %v876_v20  ;;  %783 = vmatprep.subr.mxu1 %v746_v22  ;;  %v1113_v19 = vld [vmem:[%s2850_s2 + $0x5e8] sm:$0xff]  ;;  %v995_v20 = vld [vmem:[%s2850_s2 + $0x4c0] sm:$0xff] }
  0xfd   : > { %904 = vmatprep.subr.mxu0 %v875_v23  ;;  %784 = vmatpush1.msra.mxu1 %v745_v25  ;;  %v1112_v22 = vld [vmem:[%s2850_s2 + $0x5e0] sm:$0xff]  ;;  %v852_v23 = vrot.slane %v2051_v26, 7  ;;  %v994_v25 = vld [vmem:[%s2850_s2 + $0x4b8] sm:$0xff] }
  0xfe   : > { %905 = vmatpush1.msra.mxu0 %v874_v27  ;;  %785 = vmatprep.subr.mxu1 %v744_v28  ;;  %v1111_v27 = vld [vmem:[%s2850_s2 + $0x5d8] sm:$0xff]  ;;  %v993_v28 = vld [vmem:[%s2850_s2 + $0x4b0] sm:$0xff] }
  0xff   : > { %906 = vmatprep.subr.mxu0 %v873_v29  ;;  %786 = vmatpush1.msra.mxu1 %v743_v30  ;;  %v853_v29 = vsel %vm848_vm14, %v850_v5, %v852_v23  ;;  %v1110_v30 = vld [vmem:[%s2850_s2 + $0x5d0] sm:$0xff]  ;;  %v1237_v23 = vld [vmem:[%s2850_s2 + $0x6f8] sm:$0xff] }
 0x100   : > { %907 = vmatpush1.msra.mxu0 %v872_v32  ;;  %787 = vmatprep.subr.mxu1 %v742_v33  ;;  %v992_v32 = vld [vmem:[%s2850_s2 + $0x4a8] sm:$0xff]  ;;  %v977_v5 = vld [vmem:[%s2850_s2 + $0x430] sm:$0xff] }
 0x101   : > { %908 = vmatprep.subr.mxu0 %v871_v34  ;;  %788 = vmatpush1.msra.mxu1 %v741_v35  ;;  %v1109_v33 = vld [vmem:[%s2850_s2 + $0x5c8] sm:$0xff]  ;;  %v991_v34 = vld [vmem:[%s2850_s2 + $0x4a0] sm:$0xff] }
 0x102   : > { %909 = vmatpush1.msra.mxu0 %v870_v37  ;;  %789 = vmatprep.subr.mxu1 %v740_v38  ;;  %v1108_v35 = vld [vmem:[%s2850_s2 + $0x5c0] sm:$0xff]  ;;  %v990_v37 = vld [vmem:[%s2850_s2 + $0x498] sm:$0xff] }
 0x103   : > { %910 = vmatprep.subr.mxu0 %v869_v40  ;;  %790 = vmatpush1.msra.mxu1 %v739_v41  ;;  %v1107_v38 = vld [vmem:[%s2850_s2 + $0x5b8] sm:$0xff]  ;;  %v989_v40 = vld [vmem:[%s2850_s2 + $0x490] sm:$0xff] }
 0x104   : > { %911 = vmatpush1.msra.mxu0 %v868_v42  ;;  %791 = vmatprep.subr.mxu1 %v738_v45  ;;  %v1106_v41 = vld [vmem:[%s2850_s2 + $0x5b0] sm:$0xff]  ;;  %v988_v42 = vld [vmem:[%s2850_s2 + $0x488] sm:$0xff] }
 0x105   : > { %912 = vmatprep.subr.mxu0 %v867_v46  ;;  %792 = vmatpush1.msra.mxu1 %v737_v47  ;;  %v1105_v45 = vld [vmem:[%s2850_s2 + $0x5a8] sm:$0xff]  ;;  %v987_v46 = vld [vmem:[%s2850_s2 + $0x480] sm:$0xff] }
 0x106   : > { %913 = vmatpush1.msra.mxu0 %v866_v48  ;;  %793 = vmatprep.subr.mxu1 %v736_v50  ;;  %v1104_v47 = vld [vmem:[%s2850_s2 + $0x5a0] sm:$0xff]  ;;  %v986_v48 = vld [vmem:[%s2850_s2 + $0x478] sm:$0xff] }
 0x107   : > { %914 = vmatprep.subr.mxu0 %v865_v52  ;;  %794 = vmatpush1.msra.mxu1 %v735_v53  ;;  %v1103_v50 = vld [vmem:[%s2850_s2 + $0x598] sm:$0xff]  ;;  %v1102_v52 = vld [vmem:[%s2850_s2 + $0x590] sm:$0xff]  ;;  %v984_v53 = vld [vmem:[%s2850_s2 + $0x468] sm:$0xff] }
 0x108   : > { %915 = vmatpush1.msra.mxu0 %v864_v54  ;;  %795 = vmatprep.subr.mxu1 %v734_v55  ;;  %v1101_v54 = vld [vmem:[%s2850_s2 + $0x588] sm:$0xff]  ;;  %v983_v55 = vld [vmem:[%s2850_s2 + $0x460] sm:$0xff] }
 0x109   : > { %916 = vmatprep.subr.mxu0 %v863_v58  ;;  %796 = vmatpush1.msra.mxu1 %v733_v59  ;;  %v1099_v58 = vld [vmem:[%s2850_s2 + $0x578] sm:$0xff]  ;;  %v981_v59 = vld [vmem:[%s2850_s2 + $0x450] sm:$0xff] }
 0x10a   : > { %829 = vmatprep.mubr.f32.mxu1 %v1750_v12  ;;  %917 = vmatpush1.msra.mxu0 %v862_v60  ;;  %v1098_v60 = vld [vmem:[%s2850_s2 + $0x570] sm:$0xff] }
 0x10b   : > { %1686 = vmatmul.mubr.msk.f32.vlgmr.msra.gmra.mxu1 %vm453_vm6, %v726_v21  ;;  %918 = vmatprep.subr.mxu0 %v861_v63  ;;  %v980_v63 = vld [vmem:[%s2850_s2 + $0x448] sm:$0xff]  ;;  %v1096_v21 = vld [vmem:[%s2850_s2 + $0x560] sm:$0xff] }
 0x10c   : > { %1003 = vmatprep.subr.mxu1 %v1002_v0  ;;  %919 = vmatpush1.msra.mxu0 %v860_v1  ;;  %v1097_v0 = vld [vmem:[%s2850_s2 + $0x568] sm:$0xff]  ;;  %v979_v1 = vld [vmem:[%s2850_s2 + $0x440] sm:$0xff] }
 0x10d   : > { %1004 = vmatpush1.msra.mxu1 %v1001_v3  ;;  %920 = vmatprep.subr.mxu0 %v859_v4  ;;  %v978_v3 = vld [vmem:[%s2850_s2 + $0x438] sm:$0xff] }
 0x10e   : > { %1005 = vmatprep.subr.mxu1 %v1000_v17  ;;  %835 = vmatprep.mubr.f32.mxu1 %v1750_v12  ;;  %v1095_v4 = vld [vmem:[%s2850_s2 + $0x558] sm:$0xff]  ;;  %v1094_v17 = vld [vmem:[%s2850_s2 + $0x550] sm:$0xff] }
 0x10f   : > { %921 = vmatpush1.msra.mxu0 %v858_v49  ;;  %954 = vmatprep.mubr.f32.mxu0 %v1750_v12  ;;  %v976_v49 = vld [vmem:[%s2850_s2 + $0x428] sm:$0xff] }
 0x110   : > { %1006 = vmatpush1.msra.mxu1 %v999_v8  ;;  %1687 = vmatmul.mubr.msk.f32.vlgmr.msra.gmra.mxu0 %vm2064_vm8, %v851_v10  ;;  %v1092_v8 = vld [vmem:[%s2850_s2 + $0x540] sm:$0xff]  ;;  %v1091_v10 = vld [vmem:[%s2850_s2 + $0x538] sm:$0xff] }
 0x111   : > { %836 = vmatmul.mubr.f32.gmra.mxu1 %v728_v14  ;;  %1007 = vmatprep.subr.mxu1 %v998_v9  ;;  %v974_v9 = vld [vmem:[%s2850_s2 + $0x418] sm:$0xff]  ;;  %v972_v14 = vld [vmem:[%s2850_s2 + $0x408] sm:$0xff] }
 0x112   : > { %1116 = vmatprep.subr.mxu0 %v1115_v11  ;;  %1008 = vmatpush1.msra.mxu1 %v997_v13  ;;  %v973_v11 = vld [vmem:[%s2850_s2 + $0x410] sm:$0xff] }
 0x113   : > { %1117 = vmatpush1.msra.mxu0 %v1114_v15  ;;  %1009 = vmatprep.subr.mxu1 %v996_v16  ;;  %v1090_v13 = vld [vmem:[%s2850_s2 + $0x530] sm:$0xff]  ;;  %v434_v15 = vmul.f32 0.2, %v2045_v18  ;;  %v1089_v16 = vld [vmem:[%s2850_s2 + $0x528] sm:$0xff] }
 0x114   : > { %1118 = vmatprep.subr.mxu0 %v1113_v19  ;;  %960 = vmatprep.mubr.f32.mxu0 %v1750_v12  ;;  %v971_v19 = vld [vmem:[%s2850_s2 + $0x400] sm:$0xff] }
 0x115   : > { %1010 = vmatpush1.msra.mxu1 %v995_v20  ;;  %1119 = vmatpush1.msra.mxu0 %v1112_v22  ;;  %v1088_v20 = vld [vmem:[%s2850_s2 + $0x520] sm:$0xff]  ;;  %v1087_v22 = vld [vmem:[%s2850_s2 + $0x518] sm:$0xff] }
 0x116   : > { %1688 = vmatmul.mubr.msk.f32.gmra.mxu0 %vm2122_vm11, %v853_v29  ;;  %1011 = vmatprep.subr.mxu1 %v994_v25  ;;  %v1086_v25 = vld [vmem:[%s2850_s2 + $0x510] sm:$0xff]  ;;  %v1085_v29 = vld [vmem:[%s2850_s2 + $0x508] sm:$0xff] }
 0x117   : > { %1120 = vmatprep.subr.mxu0 %v1111_v27  ;;  %1012 = vmatpush1.msra.mxu1 %v993_v28  ;;  %v442_v27 = vsel %vm426_vm15, %v2045_v18, %v434_v15  ;;  %v1236_v28 = vld [vmem:[%s2850_s2 + $0x6f0] sm:$0xff]  ;;  %v1084_v18 = vld [vmem:[%s2850_s2 + $0x500] sm:$0xff] }
 0x118   : > { %1121 = vmatpush1.msra.mxu0 %v1110_v30  ;;  %1013 = vmatprep.subr.mxu1 %v992_v32  ;;  %v1235_v30 = vld [vmem:[%s2850_s2 + $0x6e8] sm:$0xff]  ;;  %v1234_v32 = vld [vmem:[%s2850_s2 + $0x6e0] sm:$0xff]  ;;  %v1329_v15 = vld [vmem:[%s2850_s2 + $0x750] sm:$0xff] }
 0x119   : > { %1122 = vmatprep.subr.mxu0 %v1109_v33  ;;  %1014 = vmatpush1.msra.mxu1 %v991_v34  ;;  %v1233_v33 = vld [vmem:[%s2850_s2 + $0x6d8] sm:$0xff] }
 0x11a   : > { %1123 = vmatpush1.msra.mxu0 %v1108_v35  ;;  %1015 = vmatprep.subr.mxu1 %v990_v37  ;;  %v1350_v34 = vld [vmem:[%s2850_s2 + $0x7f8] sm:$0xff]  ;;  %v1232_v35 = vld [vmem:[%s2850_s2 + $0x6d0] sm:$0xff] }
 0x11b   : > { %1124 = vmatprep.subr.mxu0 %v1107_v38  ;;  %1016 = vmatpush1.msra.mxu1 %v989_v40  ;;  %v1349_v37 = vld [vmem:[%s2850_s2 + $0x7f0] sm:$0xff]  ;;  %v1231_v38 = vld [vmem:[%s2850_s2 + $0x6c8] sm:$0xff] }
 0x11c   : > { %1125 = vmatpush1.msra.mxu0 %v1106_v41  ;;  %1017 = vmatprep.subr.mxu1 %v988_v42  ;;  %v1348_v40 = vld [vmem:[%s2850_s2 + $0x7e8] sm:$0xff]  ;;  %v1347_v41 = vld [vmem:[%s2850_s2 + $0x7e0] sm:$0xff]  ;;  %v1346_v42 = vld [vmem:[%s2850_s2 + $0x7d8] sm:$0xff] }
 0x11d   : > { %1126 = vmatprep.subr.mxu0 %v1105_v45  ;;  %1018 = vmatpush1.msra.mxu1 %v987_v46  ;;  %v1228_v45 = vld [vmem:[%s2850_s2 + $0x6b0] sm:$0xff] }
 0x11e   : > { %1127 = vmatpush1.msra.mxu0 %v1104_v47  ;;  %1019 = vmatprep.subr.mxu1 %v986_v48  ;;  %v1345_v46 = vld [vmem:[%s2850_s2 + $0x7d0] sm:$0xff]  ;;  %v1227_v47 = vld [vmem:[%s2850_s2 + $0x6a8] sm:$0xff] }
 0x11f   : > { %1128 = vmatprep.subr.mxu0 %v1103_v50  ;;  %1020 = vmatpush1.msra.mxu1 %v985_v51  ;;  %v1344_v48 = vld [vmem:[%s2850_s2 + $0x7c8] sm:$0xff]  ;;  %v1226_v50 = vld [vmem:[%s2850_s2 + $0x6a0] sm:$0xff] }
 0x120   : > { %1129 = vmatpush1.msra.mxu0 %v1102_v52  ;;  %1021 = vmatprep.subr.mxu1 %v984_v53  ;;  %v1343_v51 = vld [vmem:[%s2850_s2 + $0x7c0] sm:$0xff]  ;;  %v1225_v52 = vld [vmem:[%s2850_s2 + $0x698] sm:$0xff]  ;;  %v1224_v53 = vld [vmem:[%s2850_s2 + $0x690] sm:$0xff] }
 0x121   : > { %1130 = vmatprep.subr.mxu0 %v1101_v54  ;;  %1022 = vmatpush1.msra.mxu1 %v983_v55  ;;  %v1341_v54 = vld [vmem:[%s2850_s2 + $0x7b0] sm:$0xff]  ;;  %v1223_v55 = vld [vmem:[%s2850_s2 + $0x688] sm:$0xff] }
 0x122   : > { %1131 = vmatpush1.msra.mxu0 %v1100_v56  ;;  %1023 = vmatprep.subr.mxu1 %v982_v57  ;;  %v1340_v56 = vld [vmem:[%s2850_s2 + $0x7a8] sm:$0xff]  ;;  %v1222_v57 = vld [vmem:[%s2850_s2 + $0x680] sm:$0xff] }
 0x123   : > { %1132 = vmatprep.subr.mxu0 %v1099_v58  ;;  %1024 = vmatpush1.msra.mxu1 %v981_v59  ;;  %v1339_v58 = vld [vmem:[%s2850_s2 + $0x7a0] sm:$0xff]  ;;  %v1221_v59 = vld [vmem:[%s2850_s2 + $0x678] sm:$0xff] }
 0x124   : > { %1133 = vmatpush1.msra.mxu0 %v1098_v60  ;;  %1025 = vmatprep.subr.mxu1 %v980_v63  ;;  %v1338_v60 = vld [vmem:[%s2850_s2 + $0x798] sm:$0xff]  ;;  %v1220_v63 = vld [vmem:[%s2850_s2 + $0x670] sm:$0xff] }
 0x125   : > { %1134 = vmatprep.subr.mxu0 %v1097_v0  ;;  %1026 = vmatpush1.msra.mxu1 %v979_v1  ;;  %v1337_v0 = vld [vmem:[%s2850_s2 + $0x790] sm:$0xff]  ;;  %v1219_v1 = vld [vmem:[%s2850_s2 + $0x668] sm:$0xff] }
 0x126   : > { %1135 = vmatpush1.msra.mxu0 %v1096_v21  ;;  %1027 = vmatprep.subr.mxu1 %v978_v3  ;;  %v1336_v21 = vld [vmem:[%s2850_s2 + $0x788] sm:$0xff]  ;;  %v1218_v3 = vld [vmem:[%s2850_s2 + $0x660] sm:$0xff] }
 0x127   : > { %1136 = vmatprep.subr.mxu0 %v1095_v4  ;;  %1028 = vmatpush1.msra.mxu1 %v977_v5  ;;  %v1335_v4 = vld [vmem:[%s2850_s2 + $0x780] sm:$0xff]  ;;  %v1217_v5 = vld [vmem:[%s2850_s2 + $0x658] sm:$0xff] }
 0x128   : > { %1137 = vmatpush1.msra.mxu0 %v1094_v17  ;;  %1029 = vmatprep.subr.mxu1 %v976_v49  ;;  %v1334_v17 = vld [vmem:[%s2850_s2 + $0x778] sm:$0xff]  ;;  %v1216_v49 = vld [vmem:[%s2850_s2 + $0x650] sm:$0xff] }
 0x129   : > { %1138 = vmatprep.subr.mxu0 %v1093_v6  ;;  %1030 = vmatpush1.msra.mxu1 %v975_v7  ;;  %v1333_v6 = vld [vmem:[%s2850_s2 + $0x770] sm:$0xff]  ;;  %v1215_v7 = vld [vmem:[%s2850_s2 + $0x648] sm:$0xff] }
 0x12a   : > { %1139 = vmatpush1.msra.mxu0 %v1092_v8  ;;  %1031 = vmatprep.subr.mxu1 %v974_v9  ;;  %v1332_v8 = vld [vmem:[%s2850_s2 + $0x768] sm:$0xff]  ;;  %v1214_v9 = vld [vmem:[%s2850_s2 + $0x640] sm:$0xff] }
 0x12b   : > { %1140 = vmatprep.subr.mxu0 %v1091_v10  ;;  %1032 = vmatpush1.msra.mxu1 %v973_v11  ;;  %v1331_v10 = vld [vmem:[%s2850_s2 + $0x760] sm:$0xff]  ;;  %v1213_v11 = vld [vmem:[%s2850_s2 + $0x638] sm:$0xff] }
 0x12c   : > { %1141 = vmatpush1.msra.mxu0 %v1090_v13  ;;  %1033 = vmatprep.subr.mxu1 %v972_v14  ;;  %v1330_v13 = vld [vmem:[%s2850_s2 + $0x758] sm:$0xff]  ;;  %v1212_v14 = vld [vmem:[%s2850_s2 + $0x630] sm:$0xff] }
 0x12d   : > { %1142 = vmatprep.subr.mxu0 %v1089_v16  ;;  %1034 = vmatpush1.msra.mxu1 %v971_v19  ;;  %v1211_v16 = vld [vmem:[%s2850_s2 + $0x628] sm:$0xff] }
 0x12e   : > { %1067 = vmatprep.mubr.f32.mxu1 %v1750_v12  ;;  %1143 = vmatpush1.msra.mxu0 %v1088_v20  ;;  %v1328_v19 = vld [vmem:[%s2850_s2 + $0x748] sm:$0xff]  ;;  %v1210_v20 = vld [vmem:[%s2850_s2 + $0x620] sm:$0xff] }
 0x12f   : > { %1068 = vmatmul.mubr.f32.vlgmr.msra.gmra.mxu1 %v442_v27  ;;  %1144 = vmatprep.subr.mxu0 %v1087_v22  ;;  %v1327_v22 = vld [vmem:[%s2850_s2 + $0x740] sm:$0xff]  ;;  %v1208_v27 = vld [vmem:[%s2850_s2 + $0x610] sm:$0xff] }
 0x130   : > { %1238 = vmatprep.subr.mxu1 %v1237_v23  ;;  %1145 = vmatpush1.msra.mxu0 %v1086_v25  ;;  %v1209_v23 = vld [vmem:[%s2850_s2 + $0x618] sm:$0xff] }
 0x131   : > { %1239 = vmatpush1.msra.mxu1 %v1236_v28  ;;  %1146 = vmatprep.subr.mxu0 %v1085_v29  ;;  %v1326_v25 = vld [vmem:[%s2850_s2 + $0x738] sm:$0xff]  ;;  %v1325_v28 = vld [vmem:[%s2850_s2 + $0x730] sm:$0xff]  ;;  %v1207_v29 = vld [vmem:[%s2850_s2 + $0x608] sm:$0xff] }
 0x132   : > { %1240 = vmatprep.subr.mxu1 %v1235_v30  ;;  %1073 = vmatprep.mubr.f32.mxu1 %v1750_v12  ;;  %v1198_v30 = vrot.slane %v2075_v44, 7 }
 0x133   : > { %1147 = vmatpush1.msra.mxu0 %v1084_v18  ;;  %1180 = vmatprep.mubr.f32.mxu0 %v1750_v12  ;;  %v1324_v18 = vld [vmem:[%s2850_s2 + $0x728] sm:$0xff] }
 0x134   : > { %1241 = vmatpush1.msra.mxu1 %v1234_v32  ;;  %1181 = vmatmul.mubr.f32.vlgmr.msra.gmra.mxu0 %v2274_v61  ;;  %v1230_v61 = vld [vmem:[%s2850_s2 + $0x6c0] sm:$0xff] }
 0x135   : > { %1074 = vmatmul.mubr.f32.gmra.mxu1 %v2286_v2  ;;  %1242 = vmatprep.subr.mxu1 %v1233_v33  ;;  %v1229_v2 = vld [vmem:[%s2850_s2 + $0x6b8] sm:$0xff]  ;;  %v1206_v32 = vld [vmem:[%s2850_s2 + $0x600] sm:$0xff] }
 0x136   : > { %1351 = vmatprep.subr.mxu0 %v1350_v34  ;;  %1243 = vmatpush1.msra.mxu1 %v1232_v35  ;;  %v1323_v33 = vld [vmem:[%s2850_s2 + $0x720] sm:$0xff]  ;;  %v1197_v34 = vrot.slane %v2059_v36, 7  ;;  %v1322_v35 = vld [vmem:[%s2850_s2 + $0x718] sm:$0xff] }
 0x137   : > { %1352 = vmatpush1.msra.mxu0 %v1349_v37  ;;  %1244 = vmatprep.subr.mxu1 %v1231_v38  ;;  %v1463_v37 = vld [vmem:[%s2850_s2 + $0x8f8] sm:$0xff]  ;;  %v1321_v38 = vld [vmem:[%s2850_s2 + $0x710] sm:$0xff] }
 0x138   : > { %1353 = vmatprep.subr.mxu0 %v1348_v40  ;;  %1186 = vmatprep.mubr.f32.mxu0 %v1750_v12  ;;  %v1199_v40 = vsel %vm848_vm14, %v1197_v34, %v1198_v30 }
 0x139   : > { %1245 = vmatpush1.msra.mxu1 %v1230_v61  ;;  %1354 = vmatpush1.msra.mxu0 %v1347_v41  ;;  %v1462_v61 = vld [vmem:[%s2850_s2 + $0x8f0] sm:$0xff]  ;;  %v1320_v41 = vld [vmem:[%s2850_s2 + $0x708] sm:$0xff] }
 0x13a   : > { %1187 = vmatmul.mubr.f32.gmra.mxu0 %v2051_v26  ;;  %1246 = vmatprep.subr.mxu1 %v1229_v2  ;;  %v1342_v26 = vld [vmem:[%s2850_s2 + $0x7b8] sm:$0xff]  ;;  %v1461_v2 = vld [vmem:[%s2850_s2 + $0x8e8] sm:$0xff] }
 0x13b   : > { %1355 = vmatprep.subr.mxu0 %v1346_v42  ;;  %1247 = vmatpush1.msra.mxu1 %v1228_v45  ;;  %v1200_v42 = vrot.slane %v2073_v43, 7  ;;  %v1319_v45 = vld [vmem:[%s2850_s2 + $0x700] sm:$0xff] }
 0x13c   : > { %1356 = vmatpush1.msra.mxu0 %v1345_v46  ;;  %1248 = vmatprep.subr.mxu1 %v1227_v47  ;;  %v1459_v46 = vld [vmem:[%s2850_s2 + $0x8d8] sm:$0xff]  ;;  %v1458_v47 = vld [vmem:[%s2850_s2 + $0x8d0] sm:$0xff] }
 0x13d   : > { %1357 = vmatprep.subr.mxu0 %v1344_v48  ;;  %1249 = vmatpush1.msra.mxu1 %v1226_v50  ;;  %v1201_v48 = vsel %vm848_vm14, %v1198_v30, %v1200_v42  ;;  %v1457_v50 = vld [vmem:[%s2850_s2 + $0x8c8] sm:$0xff] }
 0x13e   : > { %1358 = vmatpush1.msra.mxu0 %v1343_v51  ;;  %1250 = vmatprep.subr.mxu1 %v1225_v52  ;;  %v1456_v51 = vld [vmem:[%s2850_s2 + $0x8c0] sm:$0xff]  ;;  %v1455_v52 = vld [vmem:[%s2850_s2 + $0x8b8] sm:$0xff] }
 0x13f   : > { %1359 = vmatprep.subr.mxu0 %v1342_v26  ;;  %1251 = vmatpush1.msra.mxu1 %v1224_v53  ;;  %v1452_v26 = vld [vmem:[%s2850_s2 + $0x8a0] sm:$0xff]  ;;  %v1451_v53 = vld [vmem:[%s2850_s2 + $0x898] sm:$0xff] }
 0x140   : > { %1360 = vmatpush1.msra.mxu0 %v1341_v54  ;;  %1252 = vmatprep.subr.mxu1 %v1223_v55  ;;  %v1450_v54 = vld [vmem:[%s2850_s2 + $0x890] sm:$0xff]  ;;  %v1448_v55 = vld [vmem:[%s2850_s2 + $0x880] sm:$0xff] }
 0x141   : > { %1361 = vmatprep.subr.mxu0 %v1340_v56  ;;  %1253 = vmatpush1.msra.mxu1 %v1222_v57  ;;  %v1447_v56 = vld [vmem:[%s2850_s2 + $0x878] sm:$0xff]  ;;  %v1446_v57 = vld [vmem:[%s2850_s2 + $0x870] sm:$0xff] }
 0x142   : > { %1362 = vmatpush1.msra.mxu0 %v1339_v58  ;;  %1254 = vmatprep.subr.mxu1 %v1221_v59  ;;  %v1445_v58 = vld [vmem:[%s2850_s2 + $0x868] sm:$0xff]  ;;  %v1444_v59 = vld [vmem:[%s2850_s2 + $0x860] sm:$0xff] }
 0x143   : > { %1363 = vmatprep.subr.mxu0 %v1338_v60  ;;  %1255 = vmatpush1.msra.mxu1 %v1220_v63  ;;  %v1443_v60 = vld [vmem:[%s2850_s2 + $0x858] sm:$0xff]  ;;  %v1442_v63 = vld [vmem:[%s2850_s2 + $0x850] sm:$0xff] }
 0x144   : > { %1364 = vmatpush1.msra.mxu0 %v1337_v0  ;;  %1256 = vmatprep.subr.mxu1 %v1219_v1  ;;  %v1441_v0 = vld [vmem:[%s2850_s2 + $0x848] sm:$0xff]  ;;  %v1440_v1 = vld [vmem:[%s2850_s2 + $0x840] sm:$0xff] }
 0x145   : > { %1365 = vmatprep.subr.mxu0 %v1336_v21  ;;  %1257 = vmatpush1.msra.mxu1 %v1218_v3  ;;  %v1439_v21 = vld [vmem:[%s2850_s2 + $0x838] sm:$0xff]  ;;  %v1438_v3 = vld [vmem:[%s2850_s2 + $0x830] sm:$0xff] }
 0x146   : > { %1366 = vmatpush1.msra.mxu0 %v1335_v4  ;;  %1258 = vmatprep.subr.mxu1 %v1217_v5  ;;  %v1437_v4 = vld [vmem:[%s2850_s2 + $0x828] sm:$0xff]  ;;  %v1436_v5 = vld [vmem:[%s2850_s2 + $0x820] sm:$0xff] }
 0x147   : > { %1367 = vmatprep.subr.mxu0 %v1334_v17  ;;  %1259 = vmatpush1.msra.mxu1 %v1216_v49  ;;  %v1435_v17 = vld [vmem:[%s2850_s2 + $0x818] sm:$0xff]  ;;  %v1434_v49 = vld [vmem:[%s2850_s2 + $0x810] sm:$0xff] }
 0x148   : > { %1368 = vmatpush1.msra.mxu0 %v1333_v6  ;;  %1260 = vmatprep.subr.mxu1 %v1215_v7  ;;  %v1433_v6 = vld [vmem:[%s2850_s2 + $0x808] sm:$0xff]  ;;  %v1432_v7 = vld [vmem:[%s2850_s2 + $0x800] sm:$0xff] }
 0x149   : > { %1369 = vmatprep.subr.mxu0 %v1332_v8  ;;  %1261 = vmatpush1.msra.mxu1 %v1214_v9 }
 0x14a   : > { %1370 = vmatpush1.msra.mxu0 %v1331_v10  ;;  %1262 = vmatprep.subr.mxu1 %v1213_v11 }
 0x14b   : > { %1371 = vmatprep.subr.mxu0 %v1330_v13  ;;  %1263 = vmatpush1.msra.mxu1 %v1212_v14 }
 0x14c   : > { %1372 = vmatpush1.msra.mxu0 %v1329_v15  ;;  %1264 = vmatprep.subr.mxu1 %v1211_v16 }
 0x14d   : > { %1373 = vmatprep.subr.mxu0 %v1328_v19  ;;  %1265 = vmatpush1.msra.mxu1 %v1210_v20 }
 0x14e   : > { %1374 = vmatpush1.msra.mxu0 %v1327_v22  ;;  %1266 = vmatprep.subr.mxu1 %v1209_v23 }
 0x14f   : > { %1375 = vmatprep.subr.mxu0 %v1326_v25  ;;  %1267 = vmatpush1.msra.mxu1 %v1208_v27 }
 0x150   : > { %1376 = vmatpush1.msra.mxu0 %v1325_v28  ;;  %1268 = vmatprep.subr.mxu1 %v1207_v29 }
 0x151   : > { %1377 = vmatprep.subr.mxu0 %v1324_v18  ;;  %1269 = vmatpush1.msra.mxu1 %v1206_v32 }
 0x152   : > { %1302 = vmatprep.mubr.f32.mxu1 %v1750_v12  ;;  %1378 = vmatpush1.msra.mxu0 %v1323_v33 }
 0x153   : > { %1689 = vmatmul.mubr.msk.f32.vlgmr.msra.gmra.mxu1 %vm2064_vm8, %v1199_v40  ;;  %1379 = vmatprep.subr.mxu0 %v1322_v35 }
 0x154   : > { %1464 = vmatprep.subr.mxu1 %v1463_v37  ;;  %1380 = vmatpush1.msra.mxu0 %v1321_v38 }
 0x155   : > { %1465 = vmatpush1.msra.mxu1 %v1462_v61  ;;  %1381 = vmatprep.subr.mxu0 %v1320_v41 }
 0x156   : > { %1466 = vmatprep.subr.mxu1 %v1461_v2  ;;  %1308 = vmatprep.mubr.f32.mxu1 %v1750_v12 }
 0x157   : > { %1382 = vmatpush1.msra.mxu0 %v1319_v45  ;;  %1415 = vmatprep.mubr.f32.mxu0 %v1750_v12 }
 0x158   : > { %1467 = vmatpush1.msra.mxu1 %v1460_v39  ;;  %1416 = vmatmul.mubr.f32.vlgmr.msra.gmra.mxu0 %v2054_v31  ;;  %v1454_v31 = vld [vmem:[%s2850_s2 + $0x8b0] sm:$0xff] }
 0x159   : > { %1690 = vmatmul.mubr.msk.f32.gmra.mxu1 %vm2122_vm11, %v1201_v48  ;;  %1468 = vmatprep.subr.mxu1 %v1459_v46 }
 0x15a   : > { %1469 = vmatpush1.msra.mxu1 %v1458_v47  ;;  %1421 = vmatprep.mubr.f32.mxu0 %v1750_v12 }
 0x15b   : > { %1470 = vmatprep.subr.mxu1 %v1457_v50  ;;  %1528 = vmatprep.mubr.f32.mxu1 %v1750_v12 }
 0x15c   : > { %1471 = vmatpush1.msra.mxu1 %v1456_v51  ;;  %1422 = vmatmul.mubr.f32.gmra.mxu0 %v2059_v36  ;;  %v1449_v36 = vld [vmem:[%s2850_s2 + $0x888] sm:$0xff] }
 0x15d   : > { %1472 = vmatprep.subr.mxu1 %v1455_v52  ;;  %v1549_v52 = vsub.s32 0, %v2049_v24 }
 0x15e   : > { %1473 = vmatpush1.msra.mxu1 %v1454_v31 }
 0x15f   : > { %1474 = vmatprep.subr.mxu1 %v1453_v62 }
 0x160   : > { %1475 = vmatpush1.msra.mxu1 %v1452_v26 }
 0x161   : > { %1476 = vmatprep.subr.mxu1 %v1451_v53 }
 0x162   : > { %1477 = vmatpush1.msra.mxu1 %v1450_v54  ;;  %v1545_v54 = vld [vmem:[%s2851_s3] sm:$0x3] }
 0x163   : > { %1478 = vmatprep.subr.mxu1 %v1449_v36  ;;  %v1553_v36 = vsub.s32 1, %v2049_v24 }
 0x164   : > { %1479 = vmatpush1.msra.mxu1 %v1448_v55 }
 0x165   : > { %1480 = vmatprep.subr.mxu1 %v1447_v56 }
 0x166   : > { %1481 = vmatpush1.msra.mxu1 %v1446_v57 }
 0x167   : > { %1482 = vmatprep.subr.mxu1 %v1445_v58 }
 0x168   : > { %1483 = vmatpush1.msra.mxu1 %v1444_v59  ;;  %v1561_v59 = vld [vmem:[%s2852_s4] sm:$0x3] }
 0x169   : > { %1484 = vmatprep.subr.mxu1 %v1443_v60 }
 0x16a   : > { %1485 = vmatpush1.msra.mxu1 %v1442_v63 }
 0x16b   : > { %1486 = vmatprep.subr.mxu1 %v1441_v0  ;;  %v1550_v0 = vrot.slane %v1545_v54, %v1549_v52 }
 0x16c   : > { %1487 = vmatpush1.msra.mxu1 %v1440_v1 }
 0x16d   : > { %1488 = vmatprep.subr.mxu1 %v1439_v21 }
 0x16e   : > { %1489 = vmatpush1.msra.mxu1 %v1438_v3 }
 0x16f   : > { %1490 = vmatprep.subr.mxu1 %v1437_v4 }
 0x170   : > { %1491 = vmatpush1.msra.mxu1 %v1436_v5 }
 0x171   : > { %1492 = vmatprep.subr.mxu1 %v1435_v17  ;;  %v1566_v17 = vrot.slane %v1561_v59, %v1549_v52 }
 0x172   : > { %1493 = vmatpush1.msra.mxu1 %v1434_v49  ;;  %v1554_v49 = vrot.slane %v1545_v54, %v1553_v36 }
 0x173   : > { %1494 = vmatprep.subr.mxu1 %v1433_v6 }
 0x174   : > { %1495 = vmatpush1.msra.mxu1 %v1432_v7 }
 0x175   : > { %1529 = vmatmul.mubr.f32.vlgmr.msra.gmra.mxu1 %v2075_v44 }
 0x176   : > { %1534 = vmatprep.mubr.f32.mxu1 %v1750_v12 }
 0x179   : > { %1535 = vmatmul.mubr.f32.gmra.mxu1 %v2073_v43 }
 0x1a9   : > { %v637_v8 = vpop.f32.mrf.mxu1 }
 0x1ab   : > { %v639_v9 = vpop.f32.mrf.mxu1 }
 0x1ad   : > { %v643_v11 = vpop.f32.mrf.mxu1 }
 0x1ae   : > { %v714_v10 = vpop.f32.mrf.mxu0 }
 0x1af   : > { %v645_v14 = vpop.f32.mrf.mxu1  ;;  %v715_v35 = vadd.f32 %v714_v10, %v637_v8 }
 0x1b0   : > { %v716_v13 = vpop.f32.mrf.mxu0 }
 0x1b1   : > { %v717_v38 = vadd.f32 %v716_v13, %v639_v9 }
 0x1b3   : > { %v720_v15 = vpop.f32.mrf.mxu0 }
 0x1b4   : > { %v721_v2 = vadd.f32 %v720_v15, %v643_v11  ;;  %v1570_v11 = vrot.slane %v1561_v59, %v1553_v36 }
 0x1b5   : > { %v722_v19 = vpop.f32.mrf.mxu0 }
 0x1b6   : > { %v723_v39 = vadd.f32 %v722_v19, %v645_v14 }
 0x1cb   : > { %v831_v16 = vpop.f32.mrf.mxu1 }
 0x1cc   : > { %v842_v40 = vadd.f32 %v831_v16, %v715_v35 }
 0x1cd   : > { %v833_v20 = vpop.f32.mrf.mxu1 }
 0x1ce   : > { %v843_v42 = vadd.f32 %v833_v20, %v717_v38 }
 0x1d0   : > { %v956_v22 = vpop.f32.mrf.mxu0 }
 0x1d1   : > { %v837_v23 = vpop.f32.mrf.mxu1  ;;  %v967_v45 = vadd.f32 %v956_v22, %v842_v40 }
 0x1d2   : > { %v958_v25 = vpop.f32.mrf.mxu0  ;;  %v844_v46 = vadd.f32 %v837_v23, %v721_v2  ;;  %v1591_v2 = vld [vmem:[%s2853_s5 + $0x10] sm:$0xff] }
 0x1d3   : > { %v839_v27 = vpop.f32.mrf.mxu1  ;;  %v968_v47 = vadd.f32 %v958_v25, %v843_v42  ;;  %v1592_v42 = vld [vmem:[%s2853_s5 + $0x18] sm:$0xff] }
 0x1d4   : > { %v845_v31 = vadd.f32 %v839_v27, %v723_v39 }
 0x1d6   : > { %v962_v28 = vpop.f32.mrf.mxu0 }
 0x1d7   : > { %v969_v62 = vadd.f32 %v962_v28, %v844_v46 }
 0x1d8   : > { %v964_v29 = vpop.f32.mrf.mxu0 }
 0x1d9   : > { %v970_v55 = vadd.f32 %v964_v29, %v845_v31 }
 0x1ef   : > { %v1069_v44 = vpop.f32.mrf.mxu1 }
 0x1f0   : > { %v1080_v48 = vadd.f32 %v1069_v44, %v967_v45 }
 0x1f1   : > { %v1071_v12 = vpop.f32.mrf.mxu1 }
 0x1f2   : > { %v1081_v26 = vadd.f32 %v1071_v12, %v968_v47 }
 0x1f4   : > { %v1182_v30 = vpop.f32.mrf.mxu0 }
 0x1f5   : > { %v1075_v43 = vpop.f32.mrf.mxu1  ;;  %v1193_v53 = vadd.f32 %v1182_v30, %v1080_v48 }
 0x1f6   : > { %v1184_v18 = vpop.f32.mrf.mxu0  ;;  %v1082_v56 = vadd.f32 %v1075_v43, %v969_v62 }
 0x1f7   : > { %v1077_v32 = vpop.f32.mrf.mxu1  ;;  %v1194_v57 = vadd.f32 %v1184_v18, %v1081_v26 }
 0x1f8   : > { %v1083_v1 = vadd.f32 %v1077_v32, %v970_v55  ;;  %v1589_v32 = vld [vmem:[%s2853_s5] sm:$0xff] }
 0x1f9   : > { %v1610_v55 = vld [vmem:[#allocation2] sm:$0x1] }
 0x1fa   : > { %v1188_v33 = vpop.f32.mrf.mxu0 }
 0x1fb   : > { %v1195_v21 = vadd.f32 %v1188_v33, %v1082_v56  ;;  %v1590_v33 = vld [vmem:[%s2853_s5 + $0x8] sm:$0xff] }
 0x1fc   : > { %v1190_v37 = vpop.f32.mrf.mxu0 }
 0x1fd   : > { %v1196_v6 = vadd.f32 %v1190_v37, %v1083_v1 }
 0x213   : > { %v1304_v34 = vpop.f32.mrf.mxu1 }
 0x214   : > { %v1315_v58 = vadd.f32 %v1304_v34, %v1193_v53 }
 0x215   : > { %v1306_v61 = vpop.f32.mrf.mxu1 }
 0x216   : > { %v1316_v3 = vadd.f32 %v1306_v61, %v1194_v57 }
 0x218   : > { %v1417_v41 = vpop.f32.mrf.mxu0 }
 0x219   : > { %v1310_v50 = vpop.f32.mrf.mxu1  ;;  %v1428_v4 = vadd.f32 %v1417_v41, %v1315_v58 }
 0x21a   : > { %v1419_v51 = vpop.f32.mrf.mxu0  ;;  %v1317_v24 = vadd.f32 %v1310_v50, %v1195_v21 }
 0x21b   : > { %v1312_v60 = vpop.f32.mrf.mxu1  ;;  %v1429_v7 = vadd.f32 %v1419_v51, %v1316_v3 }
 0x21c   : > { %v1423_v63 = vpop.f32.mrf.mxu0  ;;  %v1318_v13 = vadd.f32 %v1312_v60, %v1196_v6 }
 0x21d   : > { %v1430_v14 = vadd.f32 %v1423_v63, %v1317_v24 }
 0x21e   : > { %v1425_v9 = vpop.f32.mrf.mxu0 }
 0x21f   : > { %v1431_v20 = vadd.f32 %v1425_v9, %v1318_v13 }
 0x235   : > { %v1530_v5 = vpop.f32.mrf.mxu1 }
 0x236   : > { %v1541_v8 = vadd.f32 %v1530_v5, %v1428_v4 }
 0x237   : > { %v1532_v10 = vpop.f32.mrf.mxu1 }
 0x238   : > { %v1557_v15 = vmul.f32 %v1550_v0, %v1541_v8  ;;  %v1542_v16 = vadd.f32 %v1532_v10, %v1429_v7 }
 0x239   : > { %v1536_v19 = vpop.f32.mrf.mxu1 }
 0x23a   : > { %v1573_v22 = vadd.f32 %v1566_v17, %v1557_v15  ;;  %v1558_v23 = vmul.f32 %v1554_v49, %v1542_v16  ;;  %v1543_v25 = vadd.f32 %v1536_v19, %v1430_v14 }
 0x23b   : > { %v1538_v27 = vpop.f32.mrf.mxu1 }
 0x23c   : > { %v1574_v28 = vadd.f32 %v1570_v11, %v1558_v23  ;;  %v1559_v44 = vmul.f32 %v1550_v0, %v1543_v25  ;;  %v1544_v29 = vadd.f32 %v1538_v27, %v1431_v20  ;;  %vm1577_vm0 = vcmp.gt.f32.partialorder %v1573_v22, 0.0 }
 0x23d   : > { %v1581_v12 = vmul.f32 0.2, %v1573_v22 }
 0x23e   : > { %v1575_v30 = vadd.f32 %v1566_v17, %v1559_v44  ;;  %v1560_v43 = vmul.f32 %v1554_v49, %v1544_v29  ;;  %vm1578_vm1 = vcmp.gt.f32.partialorder %v1574_v28, 0.0  ;;  %v1582_v18 = vmul.f32 0.2, %v1574_v28 }
 0x23f   : > { %v1585_v34 = vsel %vm1577_vm0, %v1573_v22, %v1581_v12 }
 0x240   : > { %v1576_v35 = vadd.f32 %v1570_v11, %v1560_v43  ;;  %v1586_v37 = vsel %vm1578_vm1, %v1574_v28, %v1582_v18  ;;  %vm1579_vm2 = vcmp.gt.f32.partialorder %v1575_v30, 0.0  ;;  %v1593_v38 = vmul.f32 %v1589_v32, %v1585_v34 }
 0x241   : > { %v1594_v40 = vmul.f32 %v1590_v33, %v1586_v37  ;;  %v1583_v61 = vmul.f32 0.2, %v1575_v30 }
 0x242   : > { %vm1580_vm3 = vcmp.gt.f32.partialorder %v1576_v35, 0.0  ;;  %v1584_v41 = vmul.f32 0.2, %v1576_v35 }
 0x243   : > { %v1597_v45 = vadd.f32 %v1594_v40, %v1593_v38  ;;  %v1587_v39 = vsel %vm1579_vm2, %v1575_v30, %v1583_v61 }
 0x244   : > { %v1588_v46 = vsel %vm1580_vm3, %v1576_v35, %v1584_v41  ;;  %v1595_v47 = vmul.f32 %v1591_v2, %v1587_v39 }
 0x245   : > { %1598 = vadd.xlane.f32.xlu0 %v1597_v45  ;;  %v1596_v48 = vmul.f32 %v1592_v42, %v1588_v46 }
 0x247   : > { %v1600_v50 = vadd.f32 %v1596_v48, %v1595_v47 }
 0x249   : > { %1601 = vadd.xlane.f32.xlu0 %v1600_v50 }
 0x2ce   : > { %v1599_v51 = vpop.xlane.xlu0 %1598 }
 0x2d2   : > { %v1602_v52 = vpop.xlane.xlu0 %1601 }
 0x2d3   : > { %v1603_v31 = vadd.f32 %v1602_v52, %v1599_v51 }
 0x2d5   : > { %v1604_v62 = vrot.slane %v1603_v31, 4 }
 0x2d7   : > { %v1605_v26 = vadd.f32 %v1604_v62, %v1603_v31 }
 0x2d9   : > { %v1606_v53 = vrot.slane %v1605_v26, 2 }
 0x2db   : > { %v1607_v54 = vadd.f32 %v1606_v53, %v1605_v26 }
 0x2dd   : > { %v1608_v36 = vrot.slane %v1607_v54, 1 }
 0x2df   : > { %v1609_v56 = vadd.f32 %v1608_v36, %v1607_v54 }
 0x2e1   : > { %v1611_v57 = vadd.f32 %v1610_v55, %v1609_v56 }
 0x2e3   : > { %v1691_v58 = vmul.f32 -1.442695, %v1611_v57 }
 0x2e5   : > { %1738 = vpow2.f32 %v1691_v58 }
 0x2f2   : > { %v1739_v59 = vpop.eup %1738 }
 0x2f3   : > { %v1615_v60 = vadd.f32 1.0, %v1739_v59 }
 0x2f5   : > { %1740 = vrcp.f32 %v1615_v60 }
 0x302   : > { %v1741_v63 = vpop.eup %1740 }
 0x303   : > { %1619 = vst.msk [vmem:[%s278_s16] sm:$0x1] %vm1618_vm4, %v1741_v63 }
 0x304 PF: > { %s19_s26 = sadd.s32 1, %s1748_s26  }
 0x305   : > { %p16_p5 = scmp.ge.s32.totalorder %s19_s26, 4  }
 0x307   :  { %18 = sbr.rel (!%p16_p5) target bundleno = 3 (0x3), region = 78 }

</bundles_post_ra>
